<compile_context>
chip_gen: v7x
topology: tpu7x:2x2x1
jax: 0.10.0
libtpu: 0.0.40
codegen_flags: <defaults>
</compile_context>

<pallas_src>
import functools

import jax
import jax.numpy as jnp
from jax import lax
from jax.experimental import pallas as pl
from jax.experimental.pallas import tpu as pltpu


def _round_up(n, m):
    return ((n + m - 1) // m) * m


def _gates_to_hc(gates, c_prev, L):
    """PyTorch LSTMCell semantics from pre-activation gates, order (i, f, g, o).

    Two full-width transcendental passes (EUP) on the whole 4L-wide tile, then
    lane-slice extraction of the quarters (XLU), instead of four narrow EUP ops.
    """
    sig = jax.nn.sigmoid(gates)
    th = jnp.tanh(gates)
    i = sig[:, 0 * L:1 * L]
    f = sig[:, 1 * L:2 * L]
    g = th[:, 2 * L:3 * L]
    o = sig[:, 3 * L:4 * L]
    c_new = f * c_prev + i * g
    h_new = o * jnp.tanh(c_new)
    return h_new, c_new


def _spectrogram_kernel(
    # packed operands (whole arrays resident in VMEM; no grid)
    xproj_ref,     # (T, Bp, 4*L1)   precomputed x @ Wih1 + b1
    states_ref,    # (6, Bp, Ls)     h1, c1, h2, c2, h3, c3 (lane-padded to Ls)
    wrec_ref,      # (3, R, C)       [Whh1 | [Wih2;Whh2] | [Wih3;Whh3]], zero-padded
    biases_ref,    # (4, 1, Wb)      [b2 | b3 | fc1b | fc2b], zero-padded
    fcw_ref,       # (2, Rf, Cf)     [fc1w_t | fc2w_t], zero-padded (fc2 lane-dense)
    # output
    out_ref,       # (Bp, out_pad)
    *, T, L1, L2, L3, L4, Bp, out_pad, unroll,
):
    # ---- hoisted weight loads / splits / bias broadcasts (once; no grid => one DMA) ----
    whh1 = wrec_ref[0][:L1, :4 * L1]
    w2 = wrec_ref[1][:L1 + L2, :4 * L2]
    wih2, whh2 = w2[:L1, :], w2[L1:, :]
    w3 = wrec_ref[2][:L2 + L3, :4 * L3]
    wih3, whh3 = w3[:L2, :], w3[L2:, :]
    b2 = jnp.broadcast_to(biases_ref[0][:, :4 * L2], (Bp, 4 * L2))
    b3 = jnp.broadcast_to(biases_ref[1][:, :4 * L3], (Bp, 4 * L3))
    fc1b = biases_ref[2][:, :L4]
    fc2b = biases_ref[3][:, :out_pad]
    fc1w = fcw_ref[0][:L3, :L4]
    fc2w = fcw_ref[1][:L4, :out_pad]

    h1 = states_ref[0][:, :L1]
    c1 = states_ref[1][:, :L1]
    h2 = states_ref[2][:, :L2]
    c2 = states_ref[3][:, :L2]
    h3 = states_ref[4][:, :L3]
    c3 = states_ref[5][:, :L3]

    # Software-pipeline prologue: layer-1 pre-activation gates for step 0.
    g1 = xproj_ref[0] + jnp.dot(h1, whh1, preferred_element_type=jnp.float32)

    def step(t, carry):
        g1, c1, h2, c2, h3, c3 = carry
        h1, c1 = _gates_to_hc(g1, c1, L1)
        # Issue next step's layer-1 matmul immediately after h1 is ready so its MXU
        # latency hides under layers 2/3 of this step (redundant compute at t == T-1).
        t_next = jnp.minimum(t + 1, T - 1)
        g1_next = xproj_ref[t_next] + jnp.dot(h1, whh1, preferred_element_type=jnp.float32)
        # Layers 2/3: two independent K-dim dots each — no in-loop lane concat.
        g2 = (jnp.dot(h1, wih2, preferred_element_type=jnp.float32)
              + jnp.dot(h2, whh2, preferred_element_type=jnp.float32) + b2)
        h2, c2 = _gates_to_hc(g2, c2, L2)
        g3 = (jnp.dot(h2, wih3, preferred_element_type=jnp.float32)
              + jnp.dot(h3, whh3, preferred_element_type=jnp.float32) + b3)
        h3, c3 = _gates_to_hc(g3, c3, L3)
        return (g1_next, c1, h2, c2, h3, c3)

    carry0 = (g1, c1, h2, c2, h3, c3)
    _, _, _, _, h3, _ = lax.fori_loop(0, T, step, carry0, unroll=unroll)

    # PyTorch loop recomputes `output` every step but only the last survives;
    # compute only the final one. fc2 output is lane-dense (out_pad = k*128).
    y = jnp.maximum(jnp.dot(h3, fc1w, preferred_element_type=jnp.float32) + fc1b, 0.0)
    out_ref[...] = jnp.dot(y, fc2w, preferred_element_type=jnp.float32) + fc2b


def prepare_params(params, hidden_dims, output_dim):
    """One-time packing of parameters into the kernel's 3 weight/bias operands.

    Keeping this out of the per-call path removes ~10 tiny per-call XLA pad/concat ops
    (review: they cost more wall-clock than the kernel itself at these shapes).
    """
    L1, L2, L3, L4 = hidden_dims
    out_pad = _round_up(max(output_dim, 128), 128)

    # Recurrent weights: [Whh1 | [Wih2;Whh2] | [Wih3;Whh3]] zero-padded to a common tile.
    w2 = jnp.concatenate([params["wih2_t"], params["whh2_t"]], axis=0)  # (L1+L2, 4*L2)
    w3 = jnp.concatenate([params["wih3_t"], params["whh3_t"]], axis=0)  # (L2+L3, 4*L3)
    mats = [params["whh1_t"], w2, w3]
    R = _round_up(max(m.shape[0] for m in mats), 8)
    C = _round_up(max(m.shape[1] for m in mats), 128)
    wrec = jnp.stack([jnp.pad(m, ((0, R - m.shape[0]), (0, C - m.shape[1]))) for m in mats])

    # Biases: [b2 | b3 | fc1b | fc2b(lane-padded)] zero-padded to a common width.
    fc2b = jnp.pad(params["fc2b"], ((0, 0), (0, out_pad - output_dim)))
    bs = [params["b2"], params["b3"], params["fc1b"], fc2b]
    Wb = _round_up(max(b.shape[1] for b in bs), 128)
    biases = jnp.stack([jnp.pad(b, ((0, 0), (0, Wb - b.shape[1]))) for b in bs])  # (4,1,Wb)

    # fc weights: [fc1w_t | fc2w_t(lane-padded)] zero-padded to a common tile.
    fc2w = jnp.pad(params["fc2w_t"], ((0, 0), (0, out_pad - output_dim)))
    fm = [params["fc1w_t"], fc2w]
    Rf = _round_up(max(m.shape[0] for m in fm), 8)
    Cf = _round_up(max(m.shape[1] for m in fm), 128)
    fcw = jnp.stack([jnp.pad(m, ((0, Rf - m.shape[0]), (0, Cf - m.shape[1]))) for m in fm])

    return dict(wih1_t=params["wih1_t"], b1=params["b1"],
                wrec=wrec, biases=biases, fcw=fcw)


@functools.partial(jax.jit, static_argnames=("hidden_dims", "output_dim"))
def spectrogram_learner_forward(x_bft, prepped, init_states, *, hidden_dims, output_dim):
    """x_bft: (B, fbins, T) float32 -> (B, output_dim) float32."""
    L1, L2, L3, L4 = hidden_dims
    B, F, T = x_bft.shape
    Bp = _round_up(max(B, 8), 8)                    # sublane-dense batch
    out_pad = _round_up(max(output_dim, 128), 128)  # lane-dense output store
    Ls = max(L1, L2, L3)

    def pad_b(a):
        return jnp.pad(a, ((0, Bp - B),) + ((0, 0),) * (a.ndim - 1))

    # Layer-1 input projection (+ bias) has no recurrent dependence: one batched matmul
    # straight from the (B, F, T) layout, hoisted out of the recurrence.
    x_pad = pad_b(x_bft)                                                  # (Bp, F, T)
    xproj = jnp.einsum('bft,fg->tbg', x_pad, prepped["wih1_t"]) + prepped["b1"]  # (T, Bp, 4*L1)

    # Pack the 6 initial states into a single operand (fewer HBM->VMEM DMAs).
    states = jnp.stack(
        [jnp.pad(pad_b(s), ((0, 0), (0, Ls - s.shape[1]))) for s in init_states])  # (6, Bp, Ls)

    operands = (xproj, states, prepped["wrec"], prepped["biases"], prepped["fcw"])

    # Advisory cost estimate so XLA schedules the tiny custom call sensibly.
    flops_step = 2 * Bp * (L1 * 4 * L1 + L1 * 4 * L2 + L2 * 4 * L2 + L2 * 4 * L3 + L3 * 4 * L3)
    flops = T * flops_step + 2 * Bp * (L3 * L4 + L4 * out_pad)
    transcendentals = T * Bp * 9 * (L1 + L2 + L3)
    bytes_accessed = sum(int(a.size) * a.dtype.itemsize for a in operands) + Bp * out_pad * 4

    kernel = functools.partial(
        _spectrogram_kernel,
        T=T, L1=L1, L2=L2, L3=L3, L4=L4, Bp=Bp, out_pad=out_pad,
        unroll=True if T <= 16 else 8,
    )

    # Single invocation (no grid): all operands sit whole in VMEM; weights DMA'd once.
    # TODO(synk): for very long T (xproj ~ 4 KiB/timestep at these dims) switch to a
    # T-grid variant (axis 'arbitrary', states in VMEM scratch, weights with constant
    # index_map, xproj blocked over T with pl.Buffered(2)); v7x's 64 MiB VMEM halves the
    # no-grid ceiling vs v5e/v6e, while on v5e/v6e raising vmem_limit_bytes further is
    # usually enough. If the workload has many independent sequences, stack them along
    # the batch dim (up to M=128 on v5e, 256 on v6e/v7x) rather than per-sequence calls.
    out = pl.pallas_call(
        kernel,
        out_shape=jax.ShapeDtypeStruct((Bp, out_pad), jnp.float32),
        compiler_params=pltpu.CompilerParams(vmem_limit_bytes=32 * 1024 * 1024),
        cost_estimate=pl.CostEstimate(flops=flops, transcendentals=transcendentals,
                                      bytes_accessed=bytes_accessed),
    )(*operands)
    return out[:B, :output_dim]


def _init_params(key, fbins, hidden_dims, output_dim):
    """Deterministic init following PyTorch default uniform(-1/sqrt(fan), 1/sqrt(fan)).

    LSTMCell weights are stored pre-transposed ((in, 4*hidden)) and the two bias
    vectors (b_ih + b_hh) are pre-summed. Gate order matches PyTorch: (i, f, g, o).
    """
    L1, L2, L3, L4 = hidden_dims
    keys = jax.random.split(key, 16)
    ki = iter(keys)

    def u(k, shape, bound):
        return jax.random.uniform(k, shape, jnp.float32, -bound, bound)

    def lstm_params(in_dim, hid):
        b = 1.0 / jnp.sqrt(jnp.float32(hid))
        wih = u(next(ki), (4 * hid, in_dim), b)   # PyTorch layout
        whh = u(next(ki), (4 * hid, hid), b)
        bih = u(next(ki), (4 * hid,), b)
        bhh = u(next(ki), (4 * hid,), b)
        return wih.T, whh.T, (bih + bhh)[None, :]

    wih1_t, whh1_t, b1 = lstm_params(fbins, L1)
    wih2_t, whh2_t, b2 = lstm_params(L1, L2)
    wih3_t, whh3_t, b3 = lstm_params(L2, L3)

    b_fc1 = 1.0 / jnp.sqrt(jnp.float32(L3))
    fc1w = u(next(ki), (L4, L3), b_fc1)
    fc1b = u(next(ki), (L4,), b_fc1)
    b_fc2 = 1.0 / jnp.sqrt(jnp.float32(L4))
    fc2w = u(next(ki), (output_dim, L4), b_fc2)
    fc2b = u(next(ki), (output_dim,), b_fc2)

    return dict(
        wih1_t=wih1_t, whh1_t=whh1_t, b1=b1,
        wih2_t=wih2_t, whh2_t=whh2_t, b2=b2,
        wih3_t=wih3_t, whh3_t=whh3_t, b3=b3,
        fc1w_t=fc1w.T, fc1b=fc1b[None, :],
        fc2w_t=fc2w.T, fc2b=fc2b[None, :],
    )


if __name__ == "__main__":
    # Small shapes consistent with the module's forward.
    B, fbins, T = 2, 16, 8
    hidden_dims = (32, 32, 32, 32)
    output_dim = 10

    key = jax.random.PRNGKey(0)
    k_x, k_p, k_s = jax.random.split(key, 3)

    x = jax.random.normal(k_x, (B, fbins, T), jnp.float32)   # (batch, fbins, tlen)
    params = _init_params(k_p, fbins, hidden_dims, output_dim)
    prepped = prepare_params(params, hidden_dims, output_dim)  # one-time packing

    # torch.rand(...) initial states -> deterministic uniform [0, 1) here.
    L1, L2, L3, _ = hidden_dims
    sk = jax.random.split(k_s, 6)
    init_states = (
        jax.random.uniform(sk[0], (B, L1), jnp.float32),     # h1
        jax.random.uniform(sk[1], (B, L1), jnp.float32),     # c1
        jax.random.uniform(sk[2], (B, L2), jnp.float32),     # h2
        jax.random.uniform(sk[3], (B, L2), jnp.float32),     # c2
        jax.random.uniform(sk[4], (B, L3), jnp.float32),     # h3
        jax.random.uniform(sk[5], (B, L3), jnp.float32),     # c3
    )

    out = spectrogram_learner_forward(x, prepped, init_states,
                                      hidden_dims=hidden_dims, output_dim=output_dim)
    out = jax.block_until_ready(out)
    assert out.shape == (B, output_dim) and out.dtype == jnp.float32

    # Pure-JAX reference check of the recurrence (unfused, per-step, PyTorch-style).
    def ref_forward():
        h1, c1, h2, c2, h3, c3 = init_states

        def cell(xi, h, c, wih_t, whh_t, b, L):
            g = xi @ wih_t + h @ whh_t + b
            i = jax.nn.sigmoid(g[:, 0 * L:1 * L])
            f = jax.nn.sigmoid(g[:, 1 * L:2 * L])
            gg = jnp.tanh(g[:, 2 * L:3 * L])
            o = jax.nn.sigmoid(g[:, 3 * L:4 * L])
            c_new = f * c + i * gg
            return o * jnp.tanh(c_new), c_new

        out_r = None
        for t in range(T):
            x_t = x[:, :, t]
            h1, c1 = cell(x_t, h1, c1, params["wih1_t"], params["whh1_t"], params["b1"], L1)
            h2, c2 = cell(h1, h2, c2, params["wih2_t"], params["whh2_t"], params["b2"], L2)
            h3, c3 = cell(h2, h3, c3, params["wih3_t"], params["whh3_t"], params["b3"], L3)
            y = jnp.maximum(h3 @ params["fc1w_t"] + params["fc1b"], 0.0)
            out_r = y @ params["fc2w_t"] + params["fc2b"]
        return out_r

    ref = jax.block_until_ready(ref_forward())
    assert jnp.allclose(out, ref, atol=1e-3, rtol=1e-3), (out, ref)

    print("KERNEL_OK")
</pallas_src>

<mosaic_0001>
module attributes {stable_mosaic.version = 11 : i64} {
  func.func @_spectrogram_kernel(%arg0: memref<8x8x128xf32, #tpu.memory_space<vmem>>, %arg1: memref<6x8x32xf32, #tpu.memory_space<vmem>>, %arg2: memref<3x64x128xf32, #tpu.memory_space<vmem>>, %arg3: memref<4x1x128xf32, #tpu.memory_space<vmem>>, %arg4: memref<2x32x128xf32, #tpu.memory_space<vmem>>, %arg5: memref<8x128xf32, #tpu.memory_space<vmem>>) attributes {dimension_semantics = [], scalar_prefetch = 0 : i64, scratch_operands = 0 : i64, tpu.core_type = #tpu.core_type<tc>} {
    %c0 = arith.constant 0 : index
    %c0_0 = arith.constant 0 : index
    %c0_1 = arith.constant 0 : index
    %0 = vector.load %arg2[%c0, %c0_0, %c0_1] : memref<3x64x128xf32, #tpu.memory_space<vmem>>, vector<1x64x128xf32>
    %1 = vector.shape_cast %0 : vector<1x64x128xf32> to vector<64x128xf32>
    %2 = vector.extract_strided_slice %1 {offsets = [0, 0], sizes = [32, 128], strides = [1, 1]} : vector<64x128xf32> to vector<32x128xf32>
    %c1 = arith.constant 1 : index
    %c0_2 = arith.constant 0 : index
    %c0_3 = arith.constant 0 : index
    %3 = vector.load %arg2[%c1, %c0_2, %c0_3] : memref<3x64x128xf32, #tpu.memory_space<vmem>>, vector<1x64x128xf32>
    %4 = vector.shape_cast %3 : vector<1x64x128xf32> to vector<64x128xf32>
    %5 = vector.extract_strided_slice %4 {offsets = [0, 0], sizes = [32, 128], strides = [1, 1]} : vector<64x128xf32> to vector<32x128xf32>
    %6 = vector.extract_strided_slice %4 {offsets = [32, 0], sizes = [32, 128], strides = [1, 1]} : vector<64x128xf32> to vector<32x128xf32>
    %c2 = arith.constant 2 : index
    %c0_4 = arith.constant 0 : index
    %c0_5 = arith.constant 0 : index
    %7 = vector.load %arg2[%c2, %c0_4, %c0_5] : memref<3x64x128xf32, #tpu.memory_space<vmem>>, vector<1x64x128xf32>
    %8 = vector.shape_cast %7 : vector<1x64x128xf32> to vector<64x128xf32>
    %9 = vector.extract_strided_slice %8 {offsets = [0, 0], sizes = [32, 128], strides = [1, 1]} : vector<64x128xf32> to vector<32x128xf32>
    %10 = vector.extract_strided_slice %8 {offsets = [32, 0], sizes = [32, 128], strides = [1, 1]} : vector<64x128xf32> to vector<32x128xf32>
    %c0_6 = arith.constant 0 : index
    %c0_7 = arith.constant 0 : index
    %c0_8 = arith.constant 0 : index
    %11 = vector.load %arg3[%c0_6, %c0_7, %c0_8] : memref<4x1x128xf32, #tpu.memory_space<vmem>>, vector<1x1x128xf32>
    %12 = vector.shape_cast %11 : vector<1x1x128xf32> to vector<1x128xf32>
    %13 = vector.shape_cast %12 : vector<1x128xf32> to vector<1x128xf32>
    %14 = vector.broadcast %13 : vector<1x128xf32> to vector<8x128xf32>
    %c1_9 = arith.constant 1 : index
    %c0_10 = arith.constant 0 : index
    %c0_11 = arith.constant 0 : index
    %15 = vector.load %arg3[%c1_9, %c0_10, %c0_11] : memref<4x1x128xf32, #tpu.memory_space<vmem>>, vector<1x1x128xf32>
    %16 = vector.shape_cast %15 : vector<1x1x128xf32> to vector<1x128xf32>
    %17 = vector.shape_cast %16 : vector<1x128xf32> to vector<1x128xf32>
    %18 = vector.broadcast %17 : vector<1x128xf32> to vector<8x128xf32>
    %c2_12 = arith.constant 2 : index
    %c0_13 = arith.constant 0 : index
    %c0_14 = arith.constant 0 : index
    %19 = vector.load %arg3[%c2_12, %c0_13, %c0_14] : memref<4x1x128xf32, #tpu.memory_space<vmem>>, vector<1x1x128xf32>
    %20 = vector.shape_cast %19 : vector<1x1x128xf32> to vector<1x128xf32>
    %21 = vector.extract_strided_slice %20 {offsets = [0, 0], sizes = [1, 32], strides = [1, 1]} : vector<1x128xf32> to vector<1x32xf32>
    %c3 = arith.constant 3 : index
    %c0_15 = arith.constant 0 : index
    %c0_16 = arith.constant 0 : index
    %22 = vector.load %arg3[%c3, %c0_15, %c0_16] : memref<4x1x128xf32, #tpu.memory_space<vmem>>, vector<1x1x128xf32>
    %23 = vector.shape_cast %22 : vector<1x1x128xf32> to vector<1x128xf32>
    %c0_17 = arith.constant 0 : index
    %c0_18 = arith.constant 0 : index
    %c0_19 = arith.constant 0 : index
    %24 = vector.load %arg4[%c0_17, %c0_18, %c0_19] : memref<2x32x128xf32, #tpu.memory_space<vmem>>, vector<1x32x128xf32>
    %25 = vector.shape_cast %24 : vector<1x32x128xf32> to vector<32x128xf32>
    %26 = vector.extract_strided_slice %25 {offsets = [0, 0], sizes = [32, 32], strides = [1, 1]} : vector<32x128xf32> to vector<32x32xf32>
    %c1_20 = arith.constant 1 : index
    %c0_21 = arith.constant 0 : index
    %c0_22 = arith.constant 0 : index
    %27 = vector.load %arg4[%c1_20, %c0_21, %c0_22] : memref<2x32x128xf32, #tpu.memory_space<vmem>>, vector<1x32x128xf32>
    %28 = vector.shape_cast %27 : vector<1x32x128xf32> to vector<32x128xf32>
    %c0_23 = arith.constant 0 : index
    %c0_24 = arith.constant 0 : index
    %c0_25 = arith.constant 0 : index
    %29 = vector.load %arg1[%c0_23, %c0_24, %c0_25] : memref<6x8x32xf32, #tpu.memory_space<vmem>>, vector<1x8x32xf32>
    %30 = vector.shape_cast %29 : vector<1x8x32xf32> to vector<8x32xf32>
    %c1_26 = arith.constant 1 : index
    %c0_27 = arith.constant 0 : index
    %c0_28 = arith.constant 0 : index
    %31 = vector.load %arg1[%c1_26, %c0_27, %c0_28] : memref<6x8x32xf32, #tpu.memory_space<vmem>>, vector<1x8x32xf32>
    %32 = vector.shape_cast %31 : vector<1x8x32xf32> to vector<8x32xf32>
    %c2_29 = arith.constant 2 : index
    %c0_30 = arith.constant 0 : index
    %c0_31 = arith.constant 0 : index
    %33 = vector.load %arg1[%c2_29, %c0_30, %c0_31] : memref<6x8x32xf32, #tpu.memory_space<vmem>>, vector<1x8x32xf32>
    %34 = vector.shape_cast %33 : vector<1x8x32xf32> to vector<8x32xf32>
    %c3_32 = arith.constant 3 : index
    %c0_33 = arith.constant 0 : index
    %c0_34 = arith.constant 0 : index
    %35 = vector.load %arg1[%c3_32, %c0_33, %c0_34] : memref<6x8x32xf32, #tpu.memory_space<vmem>>, vector<1x8x32xf32>
    %36 = vector.shape_cast %35 : vector<1x8x32xf32> to vector<8x32xf32>
    %c4 = arith.constant 4 : index
    %c0_35 = arith.constant 0 : index
    %c0_36 = arith.constant 0 : index
    %37 = vector.load %arg1[%c4, %c0_35, %c0_36] : memref<6x8x32xf32, #tpu.memory_space<vmem>>, vector<1x8x32xf32>
    %38 = vector.shape_cast %37 : vector<1x8x32xf32> to vector<8x32xf32>
    %c5 = arith.constant 5 : index
    %c0_37 = arith.constant 0 : index
    %c0_38 = arith.constant 0 : index
    %39 = vector.load %arg1[%c5, %c0_37, %c0_38] : memref<6x8x32xf32, #tpu.memory_space<vmem>>, vector<1x8x32xf32>
    %40 = vector.shape_cast %39 : vector<1x8x32xf32> to vector<8x32xf32>
    %c0_39 = arith.constant 0 : index
    %c0_40 = arith.constant 0 : index
    %c0_41 = arith.constant 0 : index
    %41 = vector.load %arg0[%c0_39, %c0_40, %c0_41] : memref<8x8x128xf32, #tpu.memory_space<vmem>>, vector<1x8x128xf32>
    %42 = vector.shape_cast %41 : vector<1x8x128xf32> to vector<8x128xf32>
    %cst = arith.constant dense<0.000000e+00> : vector<8x128xf32>
    %43 = tpu.matmul %30, %2, %cst {dimension_numbers = #tpu.dot_dimension_numbers<[1], [0], [0], [1], [0, 0, 1, 1], [], []>} : vector<8x32xf32>, vector<32x128xf32>, vector<8x128xf32> -> vector<8x128xf32>
    %44 = arith.addf %42, %43 : vector<8x128xf32>
    %c0_i32 = arith.constant 0 : i32
    %45 = arith.negf %44 : vector<8x128xf32>
    %46 = math.exp %45 : vector<8x128xf32>
    %cst_42 = arith.constant 1.000000e+00 : f32
    %47 = vector.broadcast %cst_42 : f32 to vector<8x128xf32>
    %48 = arith.addf %47, %46 : vector<8x128xf32>
    %49 = arith.divf %47, %48 : vector<8x128xf32>
    %50 = math.tanh %44 : vector<8x128xf32>
    %51 = vector.extract_strided_slice %49 {offsets = [0, 0], sizes = [8, 32], strides = [1, 1]} : vector<8x128xf32> to vector<8x32xf32>
    %52 = vector.extract_strided_slice %49 {offsets = [0, 32], sizes = [8, 32], strides = [1, 1]} : vector<8x128xf32> to vector<8x32xf32>
    %53 = vector.extract_strided_slice %50 {offsets = [0, 64], sizes = [8, 32], strides = [1, 1]} : vector<8x128xf32> to vector<8x32xf32>
    %54 = vector.extract_strided_slice %49 {offsets = [0, 96], sizes = [8, 32], strides = [1, 1]} : vector<8x128xf32> to vector<8x32xf32>
    %55 = arith.mulf %52, %32 : vector<8x32xf32>
    %56 = arith.mulf %51, %53 : vector<8x32xf32>
    %57 = arith.addf %55, %56 : vector<8x32xf32>
    %58 = math.tanh %57 : vector<8x32xf32>
    %59 = arith.mulf %54, %58 : vector<8x32xf32>
    %c1_i32 = arith.constant 1 : i32
    %60 = arith.addi %c0_i32, %c1_i32 : i32
    %c7_i32 = arith.constant 7 : i32
    %61 = arith.minsi %60, %c7_i32 : i32
    %62 = arith.index_cast %61 : i32 to index
    %c0_43 = arith.constant 0 : index
    %c0_44 = arith.constant 0 : index
    %63 = vector.load %arg0[%62, %c0_43, %c0_44] : memref<8x8x128xf32, #tpu.memory_space<vmem>>, vector<1x8x128xf32>
    %64 = vector.shape_cast %63 : vector<1x8x128xf32> to vector<8x128xf32>
    %cst_45 = arith.constant dense<0.000000e+00> : vector<8x128xf32>
    %65 = tpu.matmul %59, %2, %cst_45 {dimension_numbers = #tpu.dot_dimension_numbers<[1], [0], [0], [1], [0, 0, 1, 1], [], []>} : vector<8x32xf32>, vector<32x128xf32>, vector<8x128xf32> -> vector<8x128xf32>
    %66 = arith.addf %64, %65 : vector<8x128xf32>
    %cst_46 = arith.constant dense<0.000000e+00> : vector<8x128xf32>
    %67 = tpu.matmul %59, %5, %cst_46 {dimension_numbers = #tpu.dot_dimension_numbers<[1], [0], [0], [1], [0, 0, 1, 1], [], []>} : vector<8x32xf32>, vector<32x128xf32>, vector<8x128xf32> -> vector<8x128xf32>
    %cst_47 = arith.constant dense<0.000000e+00> : vector<8x128xf32>
    %68 = tpu.matmul %34, %6, %cst_47 {dimension_numbers = #tpu.dot_dimension_numbers<[1], [0], [0], [1], [0, 0, 1, 1], [], []>} : vector<8x32xf32>, vector<32x128xf32>, vector<8x128xf32> -> vector<8x128xf32>
    %69 = arith.addf %67, %68 : vector<8x128xf32>
    %70 = arith.addf %69, %14 : vector<8x128xf32>
    %71 = arith.negf %70 : vector<8x128xf32>
    %72 = math.exp %71 : vector<8x128xf32>
    %cst_48 = arith.constant 1.000000e+00 : f32
    %73 = vector.broadcast %cst_48 : f32 to vector<8x128xf32>
    %74 = arith.addf %73, %72 : vector<8x128xf32>
    %75 = arith.divf %73, %74 : vector<8x128xf32>
    %76 = math.tanh %70 : vector<8x128xf32>
    %77 = vector.extract_strided_slice %75 {offsets = [0, 0], sizes = [8, 32], strides = [1, 1]} : vector<8x128xf32> to vector<8x32xf32>
    %78 = vector.extract_strided_slice %75 {offsets = [0, 32], sizes = [8, 32], strides = [1, 1]} : vector<8x128xf32> to vector<8x32xf32>
    %79 = vector.extract_strided_slice %76 {offsets = [0, 64], sizes = [8, 32], strides = [1, 1]} : vector<8x128xf32> to vector<8x32xf32>
    %80 = vector.extract_strided_slice %75 {offsets = [0, 96], sizes = [8, 32], strides = [1, 1]} : vector<8x128xf32> to vector<8x32xf32>
    %81 = arith.mulf %78, %36 : vector<8x32xf32>
    %82 = arith.mulf %77, %79 : vector<8x32xf32>
    %83 = arith.addf %81, %82 : vector<8x32xf32>
    %84 = math.tanh %83 : vector<8x32xf32>
    %85 = arith.mulf %80, %84 : vector<8x32xf32>
    %cst_49 = arith.constant dense<0.000000e+00> : vector<8x128xf32>
    %86 = tpu.matmul %85, %9, %cst_49 {dimension_numbers = #tpu.dot_dimension_numbers<[1], [0], [0], [1], [0, 0, 1, 1], [], []>} : vector<8x32xf32>, vector<32x128xf32>, vector<8x128xf32> -> vector<8x128xf32>
    %cst_50 = arith.constant dense<0.000000e+00> : vector<8x128xf32>
    %87 = tpu.matmul %38, %10, %cst_50 {dimension_numbers = #tpu.dot_dimension_numbers<[1], [0], [0], [1], [0, 0, 1, 1], [], []>} : vector<8x32xf32>, vector<32x128xf32>, vector<8x128xf32> -> vector<8x128xf32>
    %88 = arith.addf %86, %87 : vector<8x128xf32>
    %89 = arith.addf %88, %18 : vector<8x128xf32>
    %90 = arith.negf %89 : vector<8x128xf32>
    %91 = math.exp %90 : vector<8x128xf32>
    %cst_51 = arith.constant 1.000000e+00 : f32
    %92 = vector.broadcast %cst_51 : f32 to vector<8x128xf32>
    %93 = arith.addf %92, %91 : vector<8x128xf32>
    %94 = arith.divf %92, %93 : vector<8x128xf32>
    %95 = math.tanh %89 : vector<8x128xf32>
    %96 = vector.extract_strided_slice %94 {offsets = [0, 0], sizes = [8, 32], strides = [1, 1]} : vector<8x128xf32> to vector<8x32xf32>
    %97 = vector.extract_strided_slice %94 {offsets = [0, 32], sizes = [8, 32], strides = [1, 1]} : vector<8x128xf32> to vector<8x32xf32>
    %98 = vector.extract_strided_slice %95 {offsets = [0, 64], sizes = [8, 32], strides = [1, 1]} : vector<8x128xf32> to vector<8x32xf32>
    %99 = vector.extract_strided_slice %94 {offsets = [0, 96], sizes = [8, 32], strides = [1, 1]} : vector<8x128xf32> to vector<8x32xf32>
    %100 = arith.mulf %97, %40 : vector<8x32xf32>
    %101 = arith.mulf %96, %98 : vector<8x32xf32>
    %102 = arith.addf %100, %101 : vector<8x32xf32>
    %103 = math.tanh %102 : vector<8x32xf32>
    %104 = arith.mulf %99, %103 : vector<8x32xf32>
    %c1_i32_52 = arith.constant 1 : i32
    %105 = arith.negf %66 : vector<8x128xf32>
    %106 = math.exp %105 : vector<8x128xf32>
    %cst_53 = arith.constant 1.000000e+00 : f32
    %107 = vector.broadcast %cst_53 : f32 to vector<8x128xf32>
    %108 = arith.addf %107, %106 : vector<8x128xf32>
    %109 = arith.divf %107, %108 : vector<8x128xf32>
    %110 = math.tanh %66 : vector<8x128xf32>
    %111 = vector.extract_strided_slice %109 {offsets = [0, 0], sizes = [8, 32], strides = [1, 1]} : vector<8x128xf32> to vector<8x32xf32>
    %112 = vector.extract_strided_slice %109 {offsets = [0, 32], sizes = [8, 32], strides = [1, 1]} : vector<8x128xf32> to vector<8x32xf32>
    %113 = vector.extract_strided_slice %110 {offsets = [0, 64], sizes = [8, 32], strides = [1, 1]} : vector<8x128xf32> to vector<8x32xf32>
    %114 = vector.extract_strided_slice %109 {offsets = [0, 96], sizes = [8, 32], strides = [1, 1]} : vector<8x128xf32> to vector<8x32xf32>
    %115 = arith.mulf %112, %57 : vector<8x32xf32>
    %116 = arith.mulf %111, %113 : vector<8x32xf32>
    %117 = arith.addf %115, %116 : vector<8x32xf32>
    %118 = math.tanh %117 : vector<8x32xf32>
    %119 = arith.mulf %114, %118 : vector<8x32xf32>
    %c1_i32_54 = arith.constant 1 : i32
    %120 = arith.addi %c1_i32_52, %c1_i32_54 : i32
    %c7_i32_55 = arith.constant 7 : i32
    %121 = arith.minsi %120, %c7_i32_55 : i32
    %122 = arith.index_cast %121 : i32 to index
    %c0_56 = arith.constant 0 : index
    %c0_57 = arith.constant 0 : index
    %123 = vector.load %arg0[%122, %c0_56, %c0_57] : memref<8x8x128xf32, #tpu.memory_space<vmem>>, vector<1x8x128xf32>
    %124 = vector.shape_cast %123 : vector<1x8x128xf32> to vector<8x128xf32>
    %cst_58 = arith.constant dense<0.000000e+00> : vector<8x128xf32>
    %125 = tpu.matmul %119, %2, %cst_58 {dimension_numbers = #tpu.dot_dimension_numbers<[1], [0], [0], [1], [0, 0, 1, 1], [], []>} : vector<8x32xf32>, vector<32x128xf32>, vector<8x128xf32> -> vector<8x128xf32>
    %126 = arith.addf %124, %125 : vector<8x128xf32>
    %cst_59 = arith.constant dense<0.000000e+00> : vector<8x128xf32>
    %127 = tpu.matmul %119, %5, %cst_59 {dimension_numbers = #tpu.dot_dimension_numbers<[1], [0], [0], [1], [0, 0, 1, 1], [], []>} : vector<8x32xf32>, vector<32x128xf32>, vector<8x128xf32> -> vector<8x128xf32>
    %cst_60 = arith.constant dense<0.000000e+00> : vector<8x128xf32>
    %128 = tpu.matmul %85, %6, %cst_60 {dimension_numbers = #tpu.dot_dimension_numbers<[1], [0], [0], [1], [0, 0, 1, 1], [], []>} : vector<8x32xf32>, vector<32x128xf32>, vector<8x128xf32> -> vector<8x128xf32>
    %129 = arith.addf %127, %128 : vector<8x128xf32>
    %130 = arith.addf %129, %14 : vector<8x128xf32>
    %131 = arith.negf %130 : vector<8x128xf32>
    %132 = math.exp %131 : vector<8x128xf32>
    %cst_61 = arith.constant 1.000000e+00 : f32
    %133 = vector.broadcast %cst_61 : f32 to vector<8x128xf32>
    %134 = arith.addf %133, %132 : vector<8x128xf32>
    %135 = arith.divf %133, %134 : vector<8x128xf32>
    %136 = math.tanh %130 : vector<8x128xf32>
    %137 = vector.extract_strided_slice %135 {offsets = [0, 0], sizes = [8, 32], strides = [1, 1]} : vector<8x128xf32> to vector<8x32xf32>
    %138 = vector.extract_strided_slice %135 {offsets = [0, 32], sizes = [8, 32], strides = [1, 1]} : vector<8x128xf32> to vector<8x32xf32>
    %139 = vector.extract_strided_slice %136 {offsets = [0, 64], sizes = [8, 32], strides = [1, 1]} : vector<8x128xf32> to vector<8x32xf32>
    %140 = vector.extract_strided_slice %135 {offsets = [0, 96], sizes = [8, 32], strides = [1, 1]} : vector<8x128xf32> to vector<8x32xf32>
    %141 = arith.mulf %138, %83 : vector<8x32xf32>
    %142 = arith.mulf %137, %139 : vector<8x32xf32>
    %143 = arith.addf %141, %142 : vector<8x32xf32>
    %144 = math.tanh %143 : vector<8x32xf32>
    %145 = arith.mulf %140, %144 : vector<8x32xf32>
    %cst_62 = arith.constant dense<0.000000e+00> : vector<8x128xf32>
    %146 = tpu.matmul %145, %9, %cst_62 {dimension_numbers = #tpu.dot_dimension_numbers<[1], [0], [0], [1], [0, 0, 1, 1], [], []>} : vector<8x32xf32>, vector<32x128xf32>, vector<8x128xf32> -> vector<8x128xf32>
    %cst_63 = arith.constant dense<0.000000e+00> : vector<8x128xf32>
    %147 = tpu.matmul %104, %10, %cst_63 {dimension_numbers = #tpu.dot_dimension_numbers<[1], [0], [0], [1], [0, 0, 1, 1], [], []>} : vector<8x32xf32>, vector<32x128xf32>, vector<8x128xf32> -> vector<8x128xf32>
    %148 = arith.addf %146, %147 : vector<8x128xf32>
    %149 = arith.addf %148, %18 : vector<8x128xf32>
    %150 = arith.negf %149 : vector<8x128xf32>
    %151 = math.exp %150 : vector<8x128xf32>
    %cst_64 = arith.constant 1.000000e+00 : f32
    %152 = vector.broadcast %cst_64 : f32 to vector<8x128xf32>
    %153 = arith.addf %152, %151 : vector<8x128xf32>
    %154 = arith.divf %152, %153 : vector<8x128xf32>
    %155 = math.tanh %149 : vector<8x128xf32>
    %156 = vector.extract_strided_slice %154 {offsets = [0, 0], sizes = [8, 32], strides = [1, 1]} : vector<8x128xf32> to vector<8x32xf32>
    %157 = vector.extract_strided_slice %154 {offsets = [0, 32], sizes = [8, 32], strides = [1, 1]} : vector<8x128xf32> to vector<8x32xf32>
    %158 = vector.extract_strided_slice %155 {offsets = [0, 64], sizes = [8, 32], strides = [1, 1]} : vector<8x128xf32> to vector<8x32xf32>
    %159 = vector.extract_strided_slice %154 {offsets = [0, 96], sizes = [8, 32], strides = [1, 1]} : vector<8x128xf32> to vector<8x32xf32>
    %160 = arith.mulf %157, %102 : vector<8x32xf32>
    %161 = arith.mulf %156, %158 : vector<8x32xf32>
    %162 = arith.addf %160, %161 : vector<8x32xf32>
    %163 = math.tanh %162 : vector<8x32xf32>
    %164 = arith.mulf %159, %163 : vector<8x32xf32>
    %c2_i32 = arith.constant 2 : i32
    %165 = arith.negf %126 : vector<8x128xf32>
    %166 = math.exp %165 : vector<8x128xf32>
    %cst_65 = arith.constant 1.000000e+00 : f32
    %167 = vector.broadcast %cst_65 : f32 to vector<8x128xf32>
    %168 = arith.addf %167, %166 : vector<8x128xf32>
    %169 = arith.divf %167, %168 : vector<8x128xf32>
    %170 = math.tanh %126 : vector<8x128xf32>
    %171 = vector.extract_strided_slice %169 {offsets = [0, 0], sizes = [8, 32], strides = [1, 1]} : vector<8x128xf32> to vector<8x32xf32>
    %172 = vector.extract_strided_slice %169 {offsets = [0, 32], sizes = [8, 32], strides = [1, 1]} : vector<8x128xf32> to vector<8x32xf32>
    %173 = vector.extract_strided_slice %170 {offsets = [0, 64], sizes = [8, 32], strides = [1, 1]} : vector<8x128xf32> to vector<8x32xf32>
    %174 = vector.extract_strided_slice %169 {offsets = [0, 96], sizes = [8, 32], strides = [1, 1]} : vector<8x128xf32> to vector<8x32xf32>
    %175 = arith.mulf %172, %117 : vector<8x32xf32>
    %176 = arith.mulf %171, %173 : vector<8x32xf32>
    %177 = arith.addf %175, %176 : vector<8x32xf32>
    %178 = math.tanh %177 : vector<8x32xf32>
    %179 = arith.mulf %174, %178 : vector<8x32xf32>
    %c1_i32_66 = arith.constant 1 : i32
    %180 = arith.addi %c2_i32, %c1_i32_66 : i32
    %c7_i32_67 = arith.constant 7 : i32
    %181 = arith.minsi %180, %c7_i32_67 : i32
    %182 = arith.index_cast %181 : i32 to index
    %c0_68 = arith.constant 0 : index
    %c0_69 = arith.constant 0 : index
    %183 = vector.load %arg0[%182, %c0_68, %c0_69] : memref<8x8x128xf32, #tpu.memory_space<vmem>>, vector<1x8x128xf32>
    %184 = vector.shape_cast %183 : vector<1x8x128xf32> to vector<8x128xf32>
    %cst_70 = arith.constant dense<0.000000e+00> : vector<8x128xf32>
    %185 = tpu.matmul %179, %2, %cst_70 {dimension_numbers = #tpu.dot_dimension_numbers<[1], [0], [0], [1], [0, 0, 1, 1], [], []>} : vector<8x32xf32>, vector<32x128xf32>, vector<8x128xf32> -> vector<8x128xf32>
    %186 = arith.addf %184, %185 : vector<8x128xf32>
    %cst_71 = arith.constant dense<0.000000e+00> : vector<8x128xf32>
    %187 = tpu.matmul %179, %5, %cst_71 {dimension_numbers = #tpu.dot_dimension_numbers<[1], [0], [0], [1], [0, 0, 1, 1], [], []>} : vector<8x32xf32>, vector<32x128xf32>, vector<8x128xf32> -> vector<8x128xf32>
    %cst_72 = arith.constant dense<0.000000e+00> : vector<8x128xf32>
    %188 = tpu.matmul %145, %6, %cst_72 {dimension_numbers = #tpu.dot_dimension_numbers<[1], [0], [0], [1], [0, 0, 1, 1], [], []>} : vector<8x32xf32>, vector<32x128xf32>, vector<8x128xf32> -> vector<8x128xf32>
    %189 = arith.addf %187, %188 : vector<8x128xf32>
    %190 = arith.addf %189, %14 : vector<8x128xf32>
    %191 = arith.negf %190 : vector<8x128xf32>
    %192 = math.exp %191 : vector<8x128xf32>
    %cst_73 = arith.constant 1.000000e+00 : f32
    %193 = vector.broadcast %cst_73 : f32 to vector<8x128xf32>
    %194 = arith.addf %193, %192 : vector<8x128xf32>
    %195 = arith.divf %193, %194 : vector<8x128xf32>
    %196 = math.tanh %190 : vector<8x128xf32>
    %197 = vector.extract_strided_slice %195 {offsets = [0, 0], sizes = [8, 32], strides = [1, 1]} : vector<8x128xf32> to vector<8x32xf32>
    %198 = vector.extract_strided_slice %195 {offsets = [0, 32], sizes = [8, 32], strides = [1, 1]} : vector<8x128xf32> to vector<8x32xf32>
    %199 = vector.extract_strided_slice %196 {offsets = [0, 64], sizes = [8, 32], strides = [1, 1]} : vector<8x128xf32> to vector<8x32xf32>
    %200 = vector.extract_strided_slice %195 {offsets = [0, 96], sizes = [8, 32], strides = [1, 1]} : vector<8x128xf32> to vector<8x32xf32>
    %201 = arith.mulf %198, %143 : vector<8x32xf32>
    %202 = arith.mulf %197, %199 : vector<8x32xf32>
    %203 = arith.addf %201, %202 : vector<8x32xf32>
    %204 = math.tanh %203 : vector<8x32xf32>
    %205 = arith.mulf %200, %204 : vector<8x32xf32>
    %cst_74 = arith.constant dense<0.000000e+00> : vector<8x128xf32>
    %206 = tpu.matmul %205, %9, %cst_74 {dimension_numbers = #tpu.dot_dimension_numbers<[1], [0], [0], [1], [0, 0, 1, 1], [], []>} : vector<8x32xf32>, vector<32x128xf32>, vector<8x128xf32> -> vector<8x128xf32>
    %cst_75 = arith.constant dense<0.000000e+00> : vector<8x128xf32>
    %207 = tpu.matmul %164, %10, %cst_75 {dimension_numbers = #tpu.dot_dimension_numbers<[1], [0], [0], [1], [0, 0, 1, 1], [], []>} : vector<8x32xf32>, vector<32x128xf32>, vector<8x128xf32> -> vector<8x128xf32>
    %208 = arith.addf %206, %207 : vector<8x128xf32>
    %209 = arith.addf %208, %18 : vector<8x128xf32>
    %210 = arith.negf %209 : vector<8x128xf32>
    %211 = math.exp %210 : vector<8x128xf32>
    %cst_76 = arith.constant 1.000000e+00 : f32
    %212 = vector.broadcast %cst_76 : f32 to vector<8x128xf32>
    %213 = arith.addf %212, %211 : vector<8x128xf32>
    %214 = arith.divf %212, %213 : vector<8x128xf32>
    %215 = math.tanh %209 : vector<8x128xf32>
    %216 = vector.extract_strided_slice %214 {offsets = [0, 0], sizes = [8, 32], strides = [1, 1]} : vector<8x128xf32> to vector<8x32xf32>
    %217 = vector.extract_strided_slice %214 {offsets = [0, 32], sizes = [8, 32], strides = [1, 1]} : vector<8x128xf32> to vector<8x32xf32>
    %218 = vector.extract_strided_slice %215 {offsets = [0, 64], sizes = [8, 32], strides = [1, 1]} : vector<8x128xf32> to vector<8x32xf32>
    %219 = vector.extract_strided_slice %214 {offsets = [0, 96], sizes = [8, 32], strides = [1, 1]} : vector<8x128xf32> to vector<8x32xf32>
    %220 = arith.mulf %217, %162 : vector<8x32xf32>
    %221 = arith.mulf %216, %218 : vector<8x32xf32>
    %222 = arith.addf %220, %221 : vector<8x32xf32>
    %223 = math.tanh %222 : vector<8x32xf32>
    %224 = arith.mulf %219, %223 : vector<8x32xf32>
    %c3_i32 = arith.constant 3 : i32
    %225 = arith.negf %186 : vector<8x128xf32>
    %226 = math.exp %225 : vector<8x128xf32>
    %cst_77 = arith.constant 1.000000e+00 : f32
    %227 = vector.broadcast %cst_77 : f32 to vector<8x128xf32>
    %228 = arith.addf %227, %226 : vector<8x128xf32>
    %229 = arith.divf %227, %228 : vector<8x128xf32>
    %230 = math.tanh %186 : vector<8x128xf32>
    %231 = vector.extract_strided_slice %229 {offsets = [0, 0], sizes = [8, 32], strides = [1, 1]} : vector<8x128xf32> to vector<8x32xf32>
    %232 = vector.extract_strided_slice %229 {offsets = [0, 32], sizes = [8, 32], strides = [1, 1]} : vector<8x128xf32> to vector<8x32xf32>
    %233 = vector.extract_strided_slice %230 {offsets = [0, 64], sizes = [8, 32], strides = [1, 1]} : vector<8x128xf32> to vector<8x32xf32>
    %234 = vector.extract_strided_slice %229 {offsets = [0, 96], sizes = [8, 32], strides = [1, 1]} : vector<8x128xf32> to vector<8x32xf32>
    %235 = arith.mulf %232, %177 : vector<8x32xf32>
    %236 = arith.mulf %231, %233 : vector<8x32xf32>
    %237 = arith.addf %235, %236 : vector<8x32xf32>
    %238 = math.tanh %237 : vector<8x32xf32>
    %239 = arith.mulf %234, %238 : vector<8x32xf32>
    %c1_i32_78 = arith.constant 1 : i32
    %240 = arith.addi %c3_i32, %c1_i32_78 : i32
    %c7_i32_79 = arith.constant 7 : i32
    %241 = arith.minsi %240, %c7_i32_79 : i32
    %242 = arith.index_cast %241 : i32 to index
    %c0_80 = arith.constant 0 : index
    %c0_81 = arith.constant 0 : index
    %243 = vector.load %arg0[%242, %c0_80, %c0_81] : memref<8x8x128xf32, #tpu.memory_space<vmem>>, vector<1x8x128xf32>
    %244 = vector.shape_cast %243 : vector<1x8x128xf32> to vector<8x128xf32>
    %cst_82 = arith.constant dense<0.000000e+00> : vector<8x128xf32>
    %245 = tpu.matmul %239, %2, %cst_82 {dimension_numbers = #tpu.dot_dimension_numbers<[1], [0], [0], [1], [0, 0, 1, 1], [], []>} : vector<8x32xf32>, vector<32x128xf32>, vector<8x128xf32> -> vector<8x128xf32>
    %246 = arith.addf %244, %245 : vector<8x128xf32>
    %cst_83 = arith.constant dense<0.000000e+00> : vector<8x128xf32>
    %247 = tpu.matmul %239, %5, %cst_83 {dimension_numbers = #tpu.dot_dimension_numbers<[1], [0], [0], [1], [0, 0, 1, 1], [], []>} : vector<8x32xf32>, vector<32x128xf32>, vector<8x128xf32> -> vector<8x128xf32>
    %cst_84 = arith.constant dense<0.000000e+00> : vector<8x128xf32>
    %248 = tpu.matmul %205, %6, %cst_84 {dimension_numbers = #tpu.dot_dimension_numbers<[1], [0], [0], [1], [0, 0, 1, 1], [], []>} : vector<8x32xf32>, vector<32x128xf32>, vector<8x128xf32> -> vector<8x128xf32>
    %249 = arith.addf %247, %248 : vector<8x128xf32>
    %250 = arith.addf %249, %14 : vector<8x128xf32>
    %251 = arith.negf %250 : vector<8x128xf32>
    %252 = math.exp %251 : vector<8x128xf32>
    %cst_85 = arith.constant 1.000000e+00 : f32
    %253 = vector.broadcast %cst_85 : f32 to vector<8x128xf32>
    %254 = arith.addf %253, %252 : vector<8x128xf32>
    %255 = arith.divf %253, %254 : vector<8x128xf32>
    %256 = math.tanh %250 : vector<8x128xf32>
    %257 = vector.extract_strided_slice %255 {offsets = [0, 0], sizes = [8, 32], strides = [1, 1]} : vector<8x128xf32> to vector<8x32xf32>
    %258 = vector.extract_strided_slice %255 {offsets = [0, 32], sizes = [8, 32], strides = [1, 1]} : vector<8x128xf32> to vector<8x32xf32>
    %259 = vector.extract_strided_slice %256 {offsets = [0, 64], sizes = [8, 32], strides = [1, 1]} : vector<8x128xf32> to vector<8x32xf32>
    %260 = vector.extract_strided_slice %255 {offsets = [0, 96], sizes = [8, 32], strides = [1, 1]} : vector<8x128xf32> to vector<8x32xf32>
    %261 = arith.mulf %258, %203 : vector<8x32xf32>
    %262 = arith.mulf %257, %259 : vector<8x32xf32>
    %263 = arith.addf %261, %262 : vector<8x32xf32>
    %264 = math.tanh %263 : vector<8x32xf32>
    %265 = arith.mulf %260, %264 : vector<8x32xf32>
    %cst_86 = arith.constant dense<0.000000e+00> : vector<8x128xf32>
    %266 = tpu.matmul %265, %9, %cst_86 {dimension_numbers = #tpu.dot_dimension_numbers<[1], [0], [0], [1], [0, 0, 1, 1], [], []>} : vector<8x32xf32>, vector<32x128xf32>, vector<8x128xf32> -> vector<8x128xf32>
    %cst_87 = arith.constant dense<0.000000e+00> : vector<8x128xf32>
    %267 = tpu.matmul %224, %10, %cst_87 {dimension_numbers = #tpu.dot_dimension_numbers<[1], [0], [0], [1], [0, 0, 1, 1], [], []>} : vector<8x32xf32>, vector<32x128xf32>, vector<8x128xf32> -> vector<8x128xf32>
    %268 = arith.addf %266, %267 : vector<8x128xf32>
    %269 = arith.addf %268, %18 : vector<8x128xf32>
    %270 = arith.negf %269 : vector<8x128xf32>
    %271 = math.exp %270 : vector<8x128xf32>
    %cst_88 = arith.constant 1.000000e+00 : f32
    %272 = vector.broadcast %cst_88 : f32 to vector<8x128xf32>
    %273 = arith.addf %272, %271 : vector<8x128xf32>
    %274 = arith.divf %272, %273 : vector<8x128xf32>
    %275 = math.tanh %269 : vector<8x128xf32>
    %276 = vector.extract_strided_slice %274 {offsets = [0, 0], sizes = [8, 32], strides = [1, 1]} : vector<8x128xf32> to vector<8x32xf32>
    %277 = vector.extract_strided_slice %274 {offsets = [0, 32], sizes = [8, 32], strides = [1, 1]} : vector<8x128xf32> to vector<8x32xf32>
    %278 = vector.extract_strided_slice %275 {offsets = [0, 64], sizes = [8, 32], strides = [1, 1]} : vector<8x128xf32> to vector<8x32xf32>
    %279 = vector.extract_strided_slice %274 {offsets = [0, 96], sizes = [8, 32], strides = [1, 1]} : vector<8x128xf32> to vector<8x32xf32>
    %280 = arith.mulf %277, %222 : vector<8x32xf32>
    %281 = arith.mulf %276, %278 : vector<8x32xf32>
    %282 = arith.addf %280, %281 : vector<8x32xf32>
    %283 = math.tanh %282 : vector<8x32xf32>
    %284 = arith.mulf %279, %283 : vector<8x32xf32>
    %c4_i32 = arith.constant 4 : i32
    %285 = arith.negf %246 : vector<8x128xf32>
    %286 = math.exp %285 : vector<8x128xf32>
    %cst_89 = arith.constant 1.000000e+00 : f32
    %287 = vector.broadcast %cst_89 : f32 to vector<8x128xf32>
    %288 = arith.addf %287, %286 : vector<8x128xf32>
    %289 = arith.divf %287, %288 : vector<8x128xf32>
    %290 = math.tanh %246 : vector<8x128xf32>
    %291 = vector.extract_strided_slice %289 {offsets = [0, 0], sizes = [8, 32], strides = [1, 1]} : vector<8x128xf32> to vector<8x32xf32>
    %292 = vector.extract_strided_slice %289 {offsets = [0, 32], sizes = [8, 32], strides = [1, 1]} : vector<8x128xf32> to vector<8x32xf32>
    %293 = vector.extract_strided_slice %290 {offsets = [0, 64], sizes = [8, 32], strides = [1, 1]} : vector<8x128xf32> to vector<8x32xf32>
    %294 = vector.extract_strided_slice %289 {offsets = [0, 96], sizes = [8, 32], strides = [1, 1]} : vector<8x128xf32> to vector<8x32xf32>
    %295 = arith.mulf %292, %237 : vector<8x32xf32>
    %296 = arith.mulf %291, %293 : vector<8x32xf32>
    %297 = arith.addf %295, %296 : vector<8x32xf32>
    %298 = math.tanh %297 : vector<8x32xf32>
    %299 = arith.mulf %294, %298 : vector<8x32xf32>
    %c1_i32_90 = arith.constant 1 : i32
    %300 = arith.addi %c4_i32, %c1_i32_90 : i32
    %c7_i32_91 = arith.constant 7 : i32
    %301 = arith.minsi %300, %c7_i32_91 : i32
    %302 = arith.index_cast %301 : i32 to index
    %c0_92 = arith.constant 0 : index
    %c0_93 = arith.constant 0 : index
    %303 = vector.load %arg0[%302, %c0_92, %c0_93] : memref<8x8x128xf32, #tpu.memory_space<vmem>>, vector<1x8x128xf32>
    %304 = vector.shape_cast %303 : vector<1x8x128xf32> to vector<8x128xf32>
    %cst_94 = arith.constant dense<0.000000e+00> : vector<8x128xf32>
    %305 = tpu.matmul %299, %2, %cst_94 {dimension_numbers = #tpu.dot_dimension_numbers<[1], [0], [0], [1], [0, 0, 1, 1], [], []>} : vector<8x32xf32>, vector<32x128xf32>, vector<8x128xf32> -> vector<8x128xf32>
    %306 = arith.addf %304, %305 : vector<8x128xf32>
    %cst_95 = arith.constant dense<0.000000e+00> : vector<8x128xf32>
    %307 = tpu.matmul %299, %5, %cst_95 {dimension_numbers = #tpu.dot_dimension_numbers<[1], [0], [0], [1], [0, 0, 1, 1], [], []>} : vector<8x32xf32>, vector<32x128xf32>, vector<8x128xf32> -> vector<8x128xf32>
    %cst_96 = arith.constant dense<0.000000e+00> : vector<8x128xf32>
    %308 = tpu.matmul %265, %6, %cst_96 {dimension_numbers = #tpu.dot_dimension_numbers<[1], [0], [0], [1], [0, 0, 1, 1], [], []>} : vector<8x32xf32>, vector<32x128xf32>, vector<8x128xf32> -> vector<8x128xf32>
    %309 = arith.addf %307, %308 : vector<8x128xf32>
    %310 = arith.addf %309, %14 : vector<8x128xf32>
    %311 = arith.negf %310 : vector<8x128xf32>
    %312 = math.exp %311 : vector<8x128xf32>
    %cst_97 = arith.constant 1.000000e+00 : f32
    %313 = vector.broadcast %cst_97 : f32 to vector<8x128xf32>
    %314 = arith.addf %313, %312 : vector<8x128xf32>
    %315 = arith.divf %313, %314 : vector<8x128xf32>
    %316 = math.tanh %310 : vector<8x128xf32>
    %317 = vector.extract_strided_slice %315 {offsets = [0, 0], sizes = [8, 32], strides = [1, 1]} : vector<8x128xf32> to vector<8x32xf32>
    %318 = vector.extract_strided_slice %315 {offsets = [0, 32], sizes = [8, 32], strides = [1, 1]} : vector<8x128xf32> to vector<8x32xf32>
    %319 = vector.extract_strided_slice %316 {offsets = [0, 64], sizes = [8, 32], strides = [1, 1]} : vector<8x128xf32> to vector<8x32xf32>
    %320 = vector.extract_strided_slice %315 {offsets = [0, 96], sizes = [8, 32], strides = [1, 1]} : vector<8x128xf32> to vector<8x32xf32>
    %321 = arith.mulf %318, %263 : vector<8x32xf32>
    %322 = arith.mulf %317, %319 : vector<8x32xf32>
    %323 = arith.addf %321, %322 : vector<8x32xf32>
    %324 = math.tanh %323 : vector<8x32xf32>
    %325 = arith.mulf %320, %324 : vector<8x32xf32>
    %cst_98 = arith.constant dense<0.000000e+00> : vector<8x128xf32>
    %326 = tpu.matmul %325, %9, %cst_98 {dimension_numbers = #tpu.dot_dimension_numbers<[1], [0], [0], [1], [0, 0, 1, 1], [], []>} : vector<8x32xf32>, vector<32x128xf32>, vector<8x128xf32> -> vector<8x128xf32>
    %cst_99 = arith.constant dense<0.000000e+00> : vector<8x128xf32>
    %327 = tpu.matmul %284, %10, %cst_99 {dimension_numbers = #tpu.dot_dimension_numbers<[1], [0], [0], [1], [0, 0, 1, 1], [], []>} : vector<8x32xf32>, vector<32x128xf32>, vector<8x128xf32> -> vector<8x128xf32>
    %328 = arith.addf %326, %327 : vector<8x128xf32>
    %329 = arith.addf %328, %18 : vector<8x128xf32>
    %330 = arith.negf %329 : vector<8x128xf32>
    %331 = math.exp %330 : vector<8x128xf32>
    %cst_100 = arith.constant 1.000000e+00 : f32
    %332 = vector.broadcast %cst_100 : f32 to vector<8x128xf32>
    %333 = arith.addf %332, %331 : vector<8x128xf32>
    %334 = arith.divf %332, %333 : vector<8x128xf32>
    %335 = math.tanh %329 : vector<8x128xf32>
    %336 = vector.extract_strided_slice %334 {offsets = [0, 0], sizes = [8, 32], strides = [1, 1]} : vector<8x128xf32> to vector<8x32xf32>
    %337 = vector.extract_strided_slice %334 {offsets = [0, 32], sizes = [8, 32], strides = [1, 1]} : vector<8x128xf32> to vector<8x32xf32>
    %338 = vector.extract_strided_slice %335 {offsets = [0, 64], sizes = [8, 32], strides = [1, 1]} : vector<8x128xf32> to vector<8x32xf32>
    %339 = vector.extract_strided_slice %334 {offsets = [0, 96], sizes = [8, 32], strides = [1, 1]} : vector<8x128xf32> to vector<8x32xf32>
    %340 = arith.mulf %337, %282 : vector<8x32xf32>
    %341 = arith.mulf %336, %338 : vector<8x32xf32>
    %342 = arith.addf %340, %341 : vector<8x32xf32>
    %343 = math.tanh %342 : vector<8x32xf32>
    %344 = arith.mulf %339, %343 : vector<8x32xf32>
    %c5_i32 = arith.constant 5 : i32
    %345 = arith.negf %306 : vector<8x128xf32>
    %346 = math.exp %345 : vector<8x128xf32>
    %cst_101 = arith.constant 1.000000e+00 : f32
    %347 = vector.broadcast %cst_101 : f32 to vector<8x128xf32>
    %348 = arith.addf %347, %346 : vector<8x128xf32>
    %349 = arith.divf %347, %348 : vector<8x128xf32>
    %350 = math.tanh %306 : vector<8x128xf32>
    %351 = vector.extract_strided_slice %349 {offsets = [0, 0], sizes = [8, 32], strides = [1, 1]} : vector<8x128xf32> to vector<8x32xf32>
    %352 = vector.extract_strided_slice %349 {offsets = [0, 32], sizes = [8, 32], strides = [1, 1]} : vector<8x128xf32> to vector<8x32xf32>
    %353 = vector.extract_strided_slice %350 {offsets = [0, 64], sizes = [8, 32], strides = [1, 1]} : vector<8x128xf32> to vector<8x32xf32>
    %354 = vector.extract_strided_slice %349 {offsets = [0, 96], sizes = [8, 32], strides = [1, 1]} : vector<8x128xf32> to vector<8x32xf32>
    %355 = arith.mulf %352, %297 : vector<8x32xf32>
    %356 = arith.mulf %351, %353 : vector<8x32xf32>
    %357 = arith.addf %355, %356 : vector<8x32xf32>
    %358 = math.tanh %357 : vector<8x32xf32>
    %359 = arith.mulf %354, %358 : vector<8x32xf32>
    %c1_i32_102 = arith.constant 1 : i32
    %360 = arith.addi %c5_i32, %c1_i32_102 : i32
    %c7_i32_103 = arith.constant 7 : i32
    %361 = arith.minsi %360, %c7_i32_103 : i32
    %362 = arith.index_cast %361 : i32 to index
    %c0_104 = arith.constant 0 : index
    %c0_105 = arith.constant 0 : index
    %363 = vector.load %arg0[%362, %c0_104, %c0_105] : memref<8x8x128xf32, #tpu.memory_space<vmem>>, vector<1x8x128xf32>
    %364 = vector.shape_cast %363 : vector<1x8x128xf32> to vector<8x128xf32>
    %cst_106 = arith.constant dense<0.000000e+00> : vector<8x128xf32>
    %365 = tpu.matmul %359, %2, %cst_106 {dimension_numbers = #tpu.dot_dimension_numbers<[1], [0], [0], [1], [0, 0, 1, 1], [], []>} : vector<8x32xf32>, vector<32x128xf32>, vector<8x128xf32> -> vector<8x128xf32>
    %366 = arith.addf %364, %365 : vector<8x128xf32>
    %cst_107 = arith.constant dense<0.000000e+00> : vector<8x128xf32>
    %367 = tpu.matmul %359, %5, %cst_107 {dimension_numbers = #tpu.dot_dimension_numbers<[1], [0], [0], [1], [0, 0, 1, 1], [], []>} : vector<8x32xf32>, vector<32x128xf32>, vector<8x128xf32> -> vector<8x128xf32>
    %cst_108 = arith.constant dense<0.000000e+00> : vector<8x128xf32>
    %368 = tpu.matmul %325, %6, %cst_108 {dimension_numbers = #tpu.dot_dimension_numbers<[1], [0], [0], [1], [0, 0, 1, 1], [], []>} : vector<8x32xf32>, vector<32x128xf32>, vector<8x128xf32> -> vector<8x128xf32>
    %369 = arith.addf %367, %368 : vector<8x128xf32>
    %370 = arith.addf %369, %14 : vector<8x128xf32>
    %371 = arith.negf %370 : vector<8x128xf32>
    %372 = math.exp %371 : vector<8x128xf32>
    %cst_109 = arith.constant 1.000000e+00 : f32
    %373 = vector.broadcast %cst_109 : f32 to vector<8x128xf32>
    %374 = arith.addf %373, %372 : vector<8x128xf32>
    %375 = arith.divf %373, %374 : vector<8x128xf32>
    %376 = math.tanh %370 : vector<8x128xf32>
    %377 = vector.extract_strided_slice %375 {offsets = [0, 0], sizes = [8, 32], strides = [1, 1]} : vector<8x128xf32> to vector<8x32xf32>
    %378 = vector.extract_strided_slice %375 {offsets = [0, 32], sizes = [8, 32], strides = [1, 1]} : vector<8x128xf32> to vector<8x32xf32>
    %379 = vector.extract_strided_slice %376 {offsets = [0, 64], sizes = [8, 32], strides = [1, 1]} : vector<8x128xf32> to vector<8x32xf32>
    %380 = vector.extract_strided_slice %375 {offsets = [0, 96], sizes = [8, 32], strides = [1, 1]} : vector<8x128xf32> to vector<8x32xf32>
    %381 = arith.mulf %378, %323 : vector<8x32xf32>
    %382 = arith.mulf %377, %379 : vector<8x32xf32>
    %383 = arith.addf %381, %382 : vector<8x32xf32>
    %384 = math.tanh %383 : vector<8x32xf32>
    %385 = arith.mulf %380, %384 : vector<8x32xf32>
    %cst_110 = arith.constant dense<0.000000e+00> : vector<8x128xf32>
    %386 = tpu.matmul %385, %9, %cst_110 {dimension_numbers = #tpu.dot_dimension_numbers<[1], [0], [0], [1], [0, 0, 1, 1], [], []>} : vector<8x32xf32>, vector<32x128xf32>, vector<8x128xf32> -> vector<8x128xf32>
    %cst_111 = arith.constant dense<0.000000e+00> : vector<8x128xf32>
    %387 = tpu.matmul %344, %10, %cst_111 {dimension_numbers = #tpu.dot_dimension_numbers<[1], [0], [0], [1], [0, 0, 1, 1], [], []>} : vector<8x32xf32>, vector<32x128xf32>, vector<8x128xf32> -> vector<8x128xf32>
    %388 = arith.addf %386, %387 : vector<8x128xf32>
    %389 = arith.addf %388, %18 : vector<8x128xf32>
    %390 = arith.negf %389 : vector<8x128xf32>
    %391 = math.exp %390 : vector<8x128xf32>
    %cst_112 = arith.constant 1.000000e+00 : f32
    %392 = vector.broadcast %cst_112 : f32 to vector<8x128xf32>
    %393 = arith.addf %392, %391 : vector<8x128xf32>
    %394 = arith.divf %392, %393 : vector<8x128xf32>
    %395 = math.tanh %389 : vector<8x128xf32>
    %396 = vector.extract_strided_slice %394 {offsets = [0, 0], sizes = [8, 32], strides = [1, 1]} : vector<8x128xf32> to vector<8x32xf32>
    %397 = vector.extract_strided_slice %394 {offsets = [0, 32], sizes = [8, 32], strides = [1, 1]} : vector<8x128xf32> to vector<8x32xf32>
    %398 = vector.extract_strided_slice %395 {offsets = [0, 64], sizes = [8, 32], strides = [1, 1]} : vector<8x128xf32> to vector<8x32xf32>
    %399 = vector.extract_strided_slice %394 {offsets = [0, 96], sizes = [8, 32], strides = [1, 1]} : vector<8x128xf32> to vector<8x32xf32>
    %400 = arith.mulf %397, %342 : vector<8x32xf32>
    %401 = arith.mulf %396, %398 : vector<8x32xf32>
    %402 = arith.addf %400, %401 : vector<8x32xf32>
    %403 = math.tanh %402 : vector<8x32xf32>
    %404 = arith.mulf %399, %403 : vector<8x32xf32>
    %c6_i32 = arith.constant 6 : i32
    %405 = arith.negf %366 : vector<8x128xf32>
    %406 = math.exp %405 : vector<8x128xf32>
    %cst_113 = arith.constant 1.000000e+00 : f32
    %407 = vector.broadcast %cst_113 : f32 to vector<8x128xf32>
    %408 = arith.addf %407, %406 : vector<8x128xf32>
    %409 = arith.divf %407, %408 : vector<8x128xf32>
    %410 = math.tanh %366 : vector<8x128xf32>
    %411 = vector.extract_strided_slice %409 {offsets = [0, 0], sizes = [8, 32], strides = [1, 1]} : vector<8x128xf32> to vector<8x32xf32>
    %412 = vector.extract_strided_slice %409 {offsets = [0, 32], sizes = [8, 32], strides = [1, 1]} : vector<8x128xf32> to vector<8x32xf32>
    %413 = vector.extract_strided_slice %410 {offsets = [0, 64], sizes = [8, 32], strides = [1, 1]} : vector<8x128xf32> to vector<8x32xf32>
    %414 = vector.extract_strided_slice %409 {offsets = [0, 96], sizes = [8, 32], strides = [1, 1]} : vector<8x128xf32> to vector<8x32xf32>
    %415 = arith.mulf %412, %357 : vector<8x32xf32>
    %416 = arith.mulf %411, %413 : vector<8x32xf32>
    %417 = arith.addf %415, %416 : vector<8x32xf32>
    %418 = math.tanh %417 : vector<8x32xf32>
    %419 = arith.mulf %414, %418 : vector<8x32xf32>
    %c1_i32_114 = arith.constant 1 : i32
    %420 = arith.addi %c6_i32, %c1_i32_114 : i32
    %c7_i32_115 = arith.constant 7 : i32
    %421 = arith.minsi %420, %c7_i32_115 : i32
    %422 = arith.index_cast %421 : i32 to index
    %c0_116 = arith.constant 0 : index
    %c0_117 = arith.constant 0 : index
    %423 = vector.load %arg0[%422, %c0_116, %c0_117] : memref<8x8x128xf32, #tpu.memory_space<vmem>>, vector<1x8x128xf32>
    %424 = vector.shape_cast %423 : vector<1x8x128xf32> to vector<8x128xf32>
    %cst_118 = arith.constant dense<0.000000e+00> : vector<8x128xf32>
    %425 = tpu.matmul %419, %2, %cst_118 {dimension_numbers = #tpu.dot_dimension_numbers<[1], [0], [0], [1], [0, 0, 1, 1], [], []>} : vector<8x32xf32>, vector<32x128xf32>, vector<8x128xf32> -> vector<8x128xf32>
    %426 = arith.addf %424, %425 : vector<8x128xf32>
    %cst_119 = arith.constant dense<0.000000e+00> : vector<8x128xf32>
    %427 = tpu.matmul %419, %5, %cst_119 {dimension_numbers = #tpu.dot_dimension_numbers<[1], [0], [0], [1], [0, 0, 1, 1], [], []>} : vector<8x32xf32>, vector<32x128xf32>, vector<8x128xf32> -> vector<8x128xf32>
    %cst_120 = arith.constant dense<0.000000e+00> : vector<8x128xf32>
    %428 = tpu.matmul %385, %6, %cst_120 {dimension_numbers = #tpu.dot_dimension_numbers<[1], [0], [0], [1], [0, 0, 1, 1], [], []>} : vector<8x32xf32>, vector<32x128xf32>, vector<8x128xf32> -> vector<8x128xf32>
    %429 = arith.addf %427, %428 : vector<8x128xf32>
    %430 = arith.addf %429, %14 : vector<8x128xf32>
    %431 = arith.negf %430 : vector<8x128xf32>
    %432 = math.exp %431 : vector<8x128xf32>
    %cst_121 = arith.constant 1.000000e+00 : f32
    %433 = vector.broadcast %cst_121 : f32 to vector<8x128xf32>
    %434 = arith.addf %433, %432 : vector<8x128xf32>
    %435 = arith.divf %433, %434 : vector<8x128xf32>
    %436 = math.tanh %430 : vector<8x128xf32>
    %437 = vector.extract_strided_slice %435 {offsets = [0, 0], sizes = [8, 32], strides = [1, 1]} : vector<8x128xf32> to vector<8x32xf32>
    %438 = vector.extract_strided_slice %435 {offsets = [0, 32], sizes = [8, 32], strides = [1, 1]} : vector<8x128xf32> to vector<8x32xf32>
    %439 = vector.extract_strided_slice %436 {offsets = [0, 64], sizes = [8, 32], strides = [1, 1]} : vector<8x128xf32> to vector<8x32xf32>
    %440 = vector.extract_strided_slice %435 {offsets = [0, 96], sizes = [8, 32], strides = [1, 1]} : vector<8x128xf32> to vector<8x32xf32>
    %441 = arith.mulf %438, %383 : vector<8x32xf32>
    %442 = arith.mulf %437, %439 : vector<8x32xf32>
    %443 = arith.addf %441, %442 : vector<8x32xf32>
    %444 = math.tanh %443 : vector<8x32xf32>
    %445 = arith.mulf %440, %444 : vector<8x32xf32>
    %cst_122 = arith.constant dense<0.000000e+00> : vector<8x128xf32>
    %446 = tpu.matmul %445, %9, %cst_122 {dimension_numbers = #tpu.dot_dimension_numbers<[1], [0], [0], [1], [0, 0, 1, 1], [], []>} : vector<8x32xf32>, vector<32x128xf32>, vector<8x128xf32> -> vector<8x128xf32>
    %cst_123 = arith.constant dense<0.000000e+00> : vector<8x128xf32>
    %447 = tpu.matmul %404, %10, %cst_123 {dimension_numbers = #tpu.dot_dimension_numbers<[1], [0], [0], [1], [0, 0, 1, 1], [], []>} : vector<8x32xf32>, vector<32x128xf32>, vector<8x128xf32> -> vector<8x128xf32>
    %448 = arith.addf %446, %447 : vector<8x128xf32>
    %449 = arith.addf %448, %18 : vector<8x128xf32>
    %450 = arith.negf %449 : vector<8x128xf32>
    %451 = math.exp %450 : vector<8x128xf32>
    %cst_124 = arith.constant 1.000000e+00 : f32
    %452 = vector.broadcast %cst_124 : f32 to vector<8x128xf32>
    %453 = arith.addf %452, %451 : vector<8x128xf32>
    %454 = arith.divf %452, %453 : vector<8x128xf32>
    %455 = math.tanh %449 : vector<8x128xf32>
    %456 = vector.extract_strided_slice %454 {offsets = [0, 0], sizes = [8, 32], strides = [1, 1]} : vector<8x128xf32> to vector<8x32xf32>
    %457 = vector.extract_strided_slice %454 {offsets = [0, 32], sizes = [8, 32], strides = [1, 1]} : vector<8x128xf32> to vector<8x32xf32>
    %458 = vector.extract_strided_slice %455 {offsets = [0, 64], sizes = [8, 32], strides = [1, 1]} : vector<8x128xf32> to vector<8x32xf32>
    %459 = vector.extract_strided_slice %454 {offsets = [0, 96], sizes = [8, 32], strides = [1, 1]} : vector<8x128xf32> to vector<8x32xf32>
    %460 = arith.mulf %457, %402 : vector<8x32xf32>
    %461 = arith.mulf %456, %458 : vector<8x32xf32>
    %462 = arith.addf %460, %461 : vector<8x32xf32>
    %463 = math.tanh %462 : vector<8x32xf32>
    %464 = arith.mulf %459, %463 : vector<8x32xf32>
    %c7_i32_125 = arith.constant 7 : i32
    %465 = arith.negf %426 : vector<8x128xf32>
    %466 = math.exp %465 : vector<8x128xf32>
    %cst_126 = arith.constant 1.000000e+00 : f32
    %467 = vector.broadcast %cst_126 : f32 to vector<8x128xf32>
    %468 = arith.addf %467, %466 : vector<8x128xf32>
    %469 = arith.divf %467, %468 : vector<8x128xf32>
    %470 = math.tanh %426 : vector<8x128xf32>
    %471 = vector.extract_strided_slice %469 {offsets = [0, 0], sizes = [8, 32], strides = [1, 1]} : vector<8x128xf32> to vector<8x32xf32>
    %472 = vector.extract_strided_slice %469 {offsets = [0, 32], sizes = [8, 32], strides = [1, 1]} : vector<8x128xf32> to vector<8x32xf32>
    %473 = vector.extract_strided_slice %470 {offsets = [0, 64], sizes = [8, 32], strides = [1, 1]} : vector<8x128xf32> to vector<8x32xf32>
    %474 = vector.extract_strided_slice %469 {offsets = [0, 96], sizes = [8, 32], strides = [1, 1]} : vector<8x128xf32> to vector<8x32xf32>
    %475 = arith.mulf %472, %417 : vector<8x32xf32>
    %476 = arith.mulf %471, %473 : vector<8x32xf32>
    %477 = arith.addf %475, %476 : vector<8x32xf32>
    %478 = math.tanh %477 : vector<8x32xf32>
    %479 = arith.mulf %474, %478 : vector<8x32xf32>
    %c1_i32_127 = arith.constant 1 : i32
    %480 = arith.addi %c7_i32_125, %c1_i32_127 : i32
    %c7_i32_128 = arith.constant 7 : i32
    %481 = arith.minsi %480, %c7_i32_128 : i32
    %482 = arith.index_cast %481 : i32 to index
    %c0_129 = arith.constant 0 : index
    %c0_130 = arith.constant 0 : index
    %483 = vector.load %arg0[%482, %c0_129, %c0_130] : memref<8x8x128xf32, #tpu.memory_space<vmem>>, vector<1x8x128xf32>
    %484 = vector.shape_cast %483 : vector<1x8x128xf32> to vector<8x128xf32>
    %cst_131 = arith.constant dense<0.000000e+00> : vector<8x128xf32>
    %485 = tpu.matmul %479, %2, %cst_131 {dimension_numbers = #tpu.dot_dimension_numbers<[1], [0], [0], [1], [0, 0, 1, 1], [], []>} : vector<8x32xf32>, vector<32x128xf32>, vector<8x128xf32> -> vector<8x128xf32>
    %486 = arith.addf %484, %485 : vector<8x128xf32>
    %cst_132 = arith.constant dense<0.000000e+00> : vector<8x128xf32>
    %487 = tpu.matmul %479, %5, %cst_132 {dimension_numbers = #tpu.dot_dimension_numbers<[1], [0], [0], [1], [0, 0, 1, 1], [], []>} : vector<8x32xf32>, vector<32x128xf32>, vector<8x128xf32> -> vector<8x128xf32>
    %cst_133 = arith.constant dense<0.000000e+00> : vector<8x128xf32>
    %488 = tpu.matmul %445, %6, %cst_133 {dimension_numbers = #tpu.dot_dimension_numbers<[1], [0], [0], [1], [0, 0, 1, 1], [], []>} : vector<8x32xf32>, vector<32x128xf32>, vector<8x128xf32> -> vector<8x128xf32>
    %489 = arith.addf %487, %488 : vector<8x128xf32>
    %490 = arith.addf %489, %14 : vector<8x128xf32>
    %491 = arith.negf %490 : vector<8x128xf32>
    %492 = math.exp %491 : vector<8x128xf32>
    %cst_134 = arith.constant 1.000000e+00 : f32
    %493 = vector.broadcast %cst_134 : f32 to vector<8x128xf32>
    %494 = arith.addf %493, %492 : vector<8x128xf32>
    %495 = arith.divf %493, %494 : vector<8x128xf32>
    %496 = math.tanh %490 : vector<8x128xf32>
    %497 = vector.extract_strided_slice %495 {offsets = [0, 0], sizes = [8, 32], strides = [1, 1]} : vector<8x128xf32> to vector<8x32xf32>
    %498 = vector.extract_strided_slice %495 {offsets = [0, 32], sizes = [8, 32], strides = [1, 1]} : vector<8x128xf32> to vector<8x32xf32>
    %499 = vector.extract_strided_slice %496 {offsets = [0, 64], sizes = [8, 32], strides = [1, 1]} : vector<8x128xf32> to vector<8x32xf32>
    %500 = vector.extract_strided_slice %495 {offsets = [0, 96], sizes = [8, 32], strides = [1, 1]} : vector<8x128xf32> to vector<8x32xf32>
    %501 = arith.mulf %498, %443 : vector<8x32xf32>
    %502 = arith.mulf %497, %499 : vector<8x32xf32>
    %503 = arith.addf %501, %502 : vector<8x32xf32>
    %504 = math.tanh %503 : vector<8x32xf32>
    %505 = arith.mulf %500, %504 : vector<8x32xf32>
    %cst_135 = arith.constant dense<0.000000e+00> : vector<8x128xf32>
    %506 = tpu.matmul %505, %9, %cst_135 {dimension_numbers = #tpu.dot_dimension_numbers<[1], [0], [0], [1], [0, 0, 1, 1], [], []>} : vector<8x32xf32>, vector<32x128xf32>, vector<8x128xf32> -> vector<8x128xf32>
    %cst_136 = arith.constant dense<0.000000e+00> : vector<8x128xf32>
    %507 = tpu.matmul %464, %10, %cst_136 {dimension_numbers = #tpu.dot_dimension_numbers<[1], [0], [0], [1], [0, 0, 1, 1], [], []>} : vector<8x32xf32>, vector<32x128xf32>, vector<8x128xf32> -> vector<8x128xf32>
    %508 = arith.addf %506, %507 : vector<8x128xf32>
    %509 = arith.addf %508, %18 : vector<8x128xf32>
    %510 = arith.negf %509 : vector<8x128xf32>
    %511 = math.exp %510 : vector<8x128xf32>
    %cst_137 = arith.constant 1.000000e+00 : f32
    %512 = vector.broadcast %cst_137 : f32 to vector<8x128xf32>
    %513 = arith.addf %512, %511 : vector<8x128xf32>
    %514 = arith.divf %512, %513 : vector<8x128xf32>
    %515 = math.tanh %509 : vector<8x128xf32>
    %516 = vector.extract_strided_slice %514 {offsets = [0, 0], sizes = [8, 32], strides = [1, 1]} : vector<8x128xf32> to vector<8x32xf32>
    %517 = vector.extract_strided_slice %514 {offsets = [0, 32], sizes = [8, 32], strides = [1, 1]} : vector<8x128xf32> to vector<8x32xf32>
    %518 = vector.extract_strided_slice %515 {offsets = [0, 64], sizes = [8, 32], strides = [1, 1]} : vector<8x128xf32> to vector<8x32xf32>
    %519 = vector.extract_strided_slice %514 {offsets = [0, 96], sizes = [8, 32], strides = [1, 1]} : vector<8x128xf32> to vector<8x32xf32>
    %520 = arith.mulf %517, %462 : vector<8x32xf32>
    %521 = arith.mulf %516, %518 : vector<8x32xf32>
    %522 = arith.addf %520, %521 : vector<8x32xf32>
    %523 = math.tanh %522 : vector<8x32xf32>
    %524 = arith.mulf %519, %523 : vector<8x32xf32>
    %c8_i32 = arith.constant 8 : i32
    %cst_138 = arith.constant dense<0.000000e+00> : vector<8x32xf32>
    %525 = tpu.matmul %524, %26, %cst_138 {dimension_numbers = #tpu.dot_dimension_numbers<[1], [0], [0], [1], [0, 0, 1, 1], [], []>} : vector<8x32xf32>, vector<32x32xf32>, vector<8x32xf32> -> vector<8x32xf32>
    %526 = vector.broadcast %21 : vector<1x32xf32> to vector<8x32xf32>
    %527 = arith.addf %525, %526 : vector<8x32xf32>
    %cst_139 = arith.constant 0.000000e+00 : f32
    %528 = vector.broadcast %cst_139 : f32 to vector<8x32xf32>
    %529 = arith.maximumf %527, %528 : vector<8x32xf32>
    %cst_140 = arith.constant dense<0.000000e+00> : vector<8x128xf32>
    %530 = tpu.matmul %529, %28, %cst_140 {dimension_numbers = #tpu.dot_dimension_numbers<[1], [0], [0], [1], [0, 0, 1, 1], [], []>} : vector<8x32xf32>, vector<32x128xf32>, vector<8x128xf32> -> vector<8x128xf32>
    %531 = vector.broadcast %23 : vector<1x128xf32> to vector<8x128xf32>
    %532 = arith.addf %530, %531 : vector<8x128xf32>
    %c0_141 = arith.constant 0 : index
    %c0_142 = arith.constant 0 : index
    %533 = vector.load %arg5[%c0_141, %c0_142] : memref<8x128xf32, #tpu.memory_space<vmem>>, vector<8x128xf32>
    tpu.vector_store %arg5[%c0_141, %c0_142], %532 {strides = array<i32>} : memref<8x128xf32, #tpu.memory_space<vmem>>, vector<8x128xf32>,
    return
  }
}

</mosaic_0001>

<bundles_post_ra>
// kernel: spectrogram_learner_forward.1
= control target key start
LH: loop header
LB: loop body
LE: loop exit
PB: predicated region body
PF: predicated region fallthrough
CT: control target
= control target key end

     0   :  { %10 = vsyncpa [#allocation3], 0  ;;  %s5787_s0 = inlined_call_operand.vmem [shape: f32[8,8,128], index: 0, kind: input, shape index: {}]   ;;  %s5788_s1 = inlined_call_operand.vmem [shape: f32[6,8,32], index: 1, kind: input, shape index: {}]   ;;  %s5789_s2 = inlined_call_operand.vmem [shape: f32[3,64,128], index: 2, kind: input, shape index: {}]   ;;  %s5790_s3 = inlined_call_operand.hbm [shape: f32[4,1,128], index: 3, kind: input, shape index: {}]   ;;  %s5791_s4 = inlined_call_operand.hbm [shape: f32[2,32,128], index: 4, kind: input, shape index: {}]   ;;  %s5792_s5 = inlined_call_operand.vmem [shape: f32[8,128], index: 5, kind: output, shape index: {}]  }
   0x1   :  { %11 = vsyncpa [#allocation5], 0  ;;  %s5104_s18 = smov [#allocation2]   ;;  %s5056_s22 = scalar_lea.hbm %s5790_s3, 64 }
   0x2   :  { %s23_s19 = sshll.u32 %s5104_s18, 4  ;;  %p5057_p0 = scmp.ne.s32.totalorder %s5790_s3, %s5056_s22  ;;  %s24_s19 = int_to_ptr.vmem [resolvable:$true] %s23_s19 }
   0x3   :  { %p5060_p1 = scmp.lt.u32.totalorder %s5056_s22, %s5790_s3 }
   0x5   :  { %p5062_p2 = pnand %p5060_p1, %p5057_p0 }
   0x7   :  { %5065 = shalt.err (!%p5062_p2)
}
   0x8   :  { %s5066_s27 = scalar_lea.vmem %s24_s19, 64  ;;  %p5071_p4 = scmp.lt.s32.totalorder %s24_s19, %s24_s19 }
   0x9   :  { %p5067_p3 = scmp.ne.s32.totalorder %s24_s19, %s5066_s27  ;;  %p5072_p5 = scmp.lt.s32.totalorder %s5066_s27, %s5066_s27 }
   0xb   :  { %p5073_p6 = por %p5072_p5, %p5071_p4 }
   0xd   :  { %p5074_p7 = pnand %p5073_p6, %p5067_p3 }
   0xf   :  { %5077 = shalt.err (!%p5074_p7)
}
  0x10   :  { %s5105_s28 = smov 16   ;;  %s5106_s29 = smov 1  }
  0x11   :  { %29 = dma.hbm_to_vmem [thread:$0]  %s5790_s3, 64, %s24_s19, [#allocation3], %s5105_s28, %s5105_s28, %s5106_s29  }
  0x12   :  { %s5107_s7 = smov [#allocation4]   ;;  %s5078_s11 = scalar_lea.hbm %s5791_s4, 1024 }
  0x13   :  { %s35_s8 = sshll.u32 %s5107_s7, 4  ;;  %p5079_p8 = scmp.ne.s32.totalorder %s5791_s4, %s5078_s11  ;;  %s36_s8 = int_to_ptr.vmem [resolvable:$true] %s35_s8 }
  0x14   :  { %p5082_p9 = scmp.lt.u32.totalorder %s5078_s11, %s5791_s4 }
  0x16   :  { %p5084_p10 = pnand %p5082_p9, %p5079_p8 }
  0x18   :  { %5087 = shalt.err (!%p5084_p10)
}
  0x19   :  { %s5088_s16 = scalar_lea.vmem %s36_s8, 1024  ;;  %p5093_p12 = scmp.lt.s32.totalorder %s36_s8, %s36_s8 }
  0x1a   :  { %p5089_p11 = scmp.ne.s32.totalorder %s36_s8, %s5088_s16  ;;  %p5094_p13 = scmp.lt.s32.totalorder %s5088_s16, %s5088_s16 }
  0x1c   :  { %p5095_p0 = por %p5094_p13, %p5093_p12 }
  0x1e   :  { %p5096_p1 = pnand %p5095_p0, %p5089_p11 }
  0x20   :  { %5099 = shalt.err (!%p5096_p1)
}
  0x21   :  { %s5108_s3 = smov 128   ;;  %s5109_s17 = smov 8  }
  0x22   :  { %41 = dma.hbm_to_vmem [thread:$0]  %s5791_s4, 1024, %s36_s8, [#allocation5], %s5108_s3, %s5108_s3, %s5109_s17  }
  0x23   :  { %5100 = dma.done.wait [#allocation3], 64  }
  0x24   :  { %5101 = vsyncadd [#allocation3], 4294967232 }
  0x25   :  { %5102 = dma.done.wait [#allocation5], 1024  }
  0x26   :  { %5103 = vsyncadd [#allocation5], 4294966272  ;;  %v5110_v0 = vmov 0.0|0.0   ;;  %vm5111_vm0 = vmmov 0   ;;  %v5112_v1 = vmov 0.0   ;;  %v48_v2 = vld [vmem:[%s5789_s2] sm:$0xff] }
  0x27   :  { %4599 = vmatprep.subr.bf16.mxu0 %v5110_v0  ;;  %4145 = vmatprep.mubr.msk.f32.mxu0 %vm5111_vm0, %v5112_v1  ;;  %v49_v3 = vld [vmem:[%s5789_s2 + $0x8] sm:$0xff]  ;;  %v50_v4 = vld [vmem:[%s5789_s2 + $0x10] sm:$0xff]  ;;  %v51_v6 = vld [vmem:[%s5789_s2 + $0x18] sm:$0xff]  ;;  %vm110_vm1 = vcmask 261120   ;;  %s5113_s6 = smov 64   ;;  %s5114_s9 = smov 32  }
  0x28   :  { %4605 = vmatprep.subr.bf16.mxu1 %v5110_v0  ;;  %4156 = vmatprep.mubr.msk.f32.mxu1 %vm5111_vm0, %v5112_v1  ;;  %v5184_v5 = vpack.c.bf16 %v49_v3, %v48_v2  ;;  %v5190_v7 = vpack.c.bf16 %v51_v6, %v50_v4  ;;  %v98_v8 = vld [vmem:[%s5788_s1] sm:$0xff]  ;;  %v3847_v14 = vld [vmem:[%s5788_s1 + $0x8] sm:$0xff]  ;;  %v3835_v29 = vld [vmem:[%s5789_s2 + $0x70] sm:$0xff] }
  0x29   :  { %v109_v9 = vld [vmem:[%s5787_s0] sm:$0xff]  ;;  %v3834_v26 = vld [vmem:[%s5789_s2 + $0x68] sm:$0xff]  ;;  %v3836_v30 = vld [vmem:[%s5789_s2 + $0x78] sm:$0xff] }
  0x2a   :  { %4601 = vmatpush3.bf16.msra.mxu0 %v5184_v5  ;;  %4607 = vmatpush3.bf16.msra.mxu1 %v5184_v5  ;;  %v3833_v25 = vld [vmem:[%s5789_s2 + $0x60] sm:$0xff]  ;;  %v5234_v31 = vpack.c.bf16 %v3836_v30, %v3835_v29  ;;  %v3848_v32 = vld [vmem:[%s5788_s1 + $0x10] sm:$0xff]  ;;  %v3830_v36 = vld [vmem:[%s5789_s2 + $0x48] sm:$0xff] }
  0x2b   :  { %4602 = vmatprep.subr.bf16.mxu0 %v5110_v0  ;;  %4608 = vmatprep.subr.bf16.mxu1 %v5110_v0  ;;  %v5223_v27 = vpack.c.bf16 %v3834_v26, %v3833_v25  ;;  %v3829_v35 = vld [vmem:[%s5789_s2 + $0x40] sm:$0xff]  ;;  %v3831_v38 = vld [vmem:[%s5789_s2 + $0x50] sm:$0xff]  ;;  %v3832_v39 = vld [vmem:[%s5789_s2 + $0x58] sm:$0xff] }
  0x2c   :  { %v5251_v37 = vpack.c.bf16 %v3830_v36, %v3829_v35  ;;  %v5261_v41 = vpack.c.bf16 %v3832_v39, %v3831_v38  ;;  %v3854_v44 = vld [vmem:[%s5787_s0 + $0x8] sm:$0xff]  ;;  %v5274_v48 = vld [vmem:[#allocation2] ss:$0 sm:$0xff]  ;;  %v3849_v55 = vld [vmem:[%s5788_s1 + $0x18] sm:$0xff] }
  0x2d   :  { %v3838_v25 = vld [vmem:[%s5789_s2 + $0x88] sm:$0xff]  ;;  %v3840_v29 = vld [vmem:[%s5789_s2 + $0x98] sm:$0xff] }
  0x2e   :  { %4604 = vmatpush3.bf16.msra.mxu0 %v5190_v7  ;;  %4610 = vmatpush3.bf16.msra.mxu1 %v5190_v7 }
  0x2f   :  { %4611 = vmatprep.subr.bf16.mxu0 %v5110_v0  ;;  %4617 = vmatprep.subr.bf16.mxu1 %v5110_v0 }
  0x31   :  { %4146 = vmatmul.mubr.msk.f32.vlgmr.msra.gmra.mrb[0].mxu0 %vm110_vm1, %v98_v8 }
  0x32   :  { %4167 = vmatprep.mubr.msk.f32.mxu0 %vm5111_vm0, %v5112_v1  ;;  %4613 = vmatpush3.bf16.msra.mxu0 %v5223_v27 }
  0x33   :  { %4614 = vmatprep.subr.bf16.mxu0 %v5110_v0 }
  0x36   :  { %4616 = vmatpush3.bf16.msra.mxu0 %v5234_v31 }
  0x37   :  { %4623 = vmatprep.subr.bf16.mxu0 %v5110_v0 }
  0x39   :  { %4168 = vmatmul.mubr.msk.f32.vlgmr.msra.gmra.mrb[2].mxu0 %vm110_vm1, %v3848_v32 }
  0x3a   :  { %4189 = vmatprep.mubr.msk.f32.mxu0 %vm5111_vm0, %v5112_v1 }
 0x104   :  { %v180_v10 = vpop.f32.mrb[0].mxu0 }
 0x105   :  { %v184_v11 = vadd.f32 %v180_v10, %v109_v9  ;;  %v4147_v12 = vpop.f32.mrb[1].mxu0 }
 0x107   :  { %4862 = vtanh.f32 %v184_v11  ;;  %v3853_v15 = vmul.f32 -1.442695, %v184_v11 }
 0x109   :  { %4864 = vpow2.f32 %v3853_v15 }
 0x10c   :  { %v360_v42 = vpop.f32.mrb[2].mxu0 }
 0x10d   :  { %v4169_v43 = vpop.f32.mrb[3].mxu0 }
 0x111   :  { %v4863_v13 = vpop.eup %4862 }
 0x112   :  { %198 = vrot.lane.b32.xlu0 %v4863_v13, %s5113_s6 }
 0x113   :  { %v4865_v16 = vpop.eup %4864 }
 0x114   :  { %v188_v17 = vadd.f32 1.0, %v4865_v16  ;;  %v3841_v16 = vld [vmem:[%s5789_s2 + $0xa0] sm:$0xff] }
 0x116   :  { %193 = vrot.lane.b32.xlu0 %v3847_v14, %s5114_s9  ;;  %4866 = vrcp.f32 %v188_v17  ;;  %v3842_v17 = vld [vmem:[%s5789_s2 + $0xa8] sm:$0xff] }
 0x120   :  { %v4867_v18 = vpop.eup %4866 }
 0x184   :  { %v199_v19 = vpop.permute.xlu0 %198 }
 0x185   :  { %v201_v20 = vmul.f32 %v4867_v18, %v199_v19  ;;  %v5302_v19 = vpack.c.bf16 %v3842_v17, %v3841_v16 }
 0x187   :  { %203 = vrot.lane.b32.xlu1 %v201_v20, %s5114_s9  ;;  %v3844_v20 = vld [vmem:[%s5789_s2 + $0xb8] sm:$0xff]  ;;  %4625 = vmatpush3.bf16.msra.mxu0 %v5302_v19 }
 0x188   :  { %v194_v21 = vpop.permute.xlu0 %193  ;;  %4626 = vmatprep.subr.bf16.mxu0 %v5110_v0 }
 0x189   :  { %v196_v22 = vmul.f32 %v4867_v18, %v194_v21 }
 0x1f9   :  { %v204_v23 = vpop.permute.xlu1 %203 }
 0x1fa   :  { %v5214_v24 = vadd.f32 %v204_v23, %v196_v22  ;;  %v3850_v22 = vld [vmem:[%s5788_s1 + $0x20] sm:$0xff] }
 0x1fc   :  { %4868 = vtanh.f32 %v5214_v24 }
 0x206   :  { %v4869_v28 = vpop.eup %4868 }
 0x207   :  { %209 = vrot.lane.b32.xlu1 %v4869_v28, %s5113_s6  ;;  %v3839_v28 = vld [vmem:[%s5789_s2 + $0x90] sm:$0xff] }
 0x208   :  { %v5340_v30 = vpack.c.bf16 %v3840_v29, %v3839_v28 }
 0x279   :  { %v210_v33 = vpop.permute.xlu1 %209 }
 0x27a   :  { %v212_v34 = vmul.f32 %v4867_v18, %v210_v33  ;;  %v3843_v18 = vld [vmem:[%s5789_s2 + $0xb0] sm:$0xff] }
 0x27b   :  { %v5308_v21 = vpack.c.bf16 %v3844_v20, %v3843_v18 }
 0x27c   :  { %216 = vrot.lane.b32.xlu0 %v212_v34, %s5114_s9 }
 0x27d   :  { %4628 = vmatpush3.bf16.msra.mxu0 %v5308_v21 }
 0x27e   :  { %4635 = vmatprep.subr.bf16.mxu0 %v5110_v0 }
 0x280   :  { %4190 = vmatmul.mubr.msk.f32.vlgmr.msra.gmra.mrb[4].mxu0 %vm110_vm1, %v3850_v22 }
 0x281   :  { %4637 = vmatpush3.bf16.msra.mxu0 %v5184_v5  ;;  %4211 = vmatprep.mubr.msk.f32.mxu0 %vm5111_vm0, %v5112_v1 }
 0x282   :  { %4638 = vmatprep.subr.bf16.mxu0 %v5110_v0 }
 0x285   :  { %4640 = vmatpush3.bf16.msra.mxu0 %v5190_v7 }
 0x286   :  { %4647 = vmatprep.subr.bf16.mxu0 %v5110_v0 }
 0x2ee   :  { %v217_v40 = vpop.permute.xlu0 %216 }
 0x2ef   :  { %4157 = vmatmul.mubr.msk.f32.vlgmr.msra.gmra.mrb[0].mxu1 %vm110_vm1, %v217_v40 }
 0x2f0   :  { %4619 = vmatpush3.bf16.msra.mxu1 %v5251_v37  ;;  %4178 = vmatprep.mubr.msk.f32.mxu1 %vm5111_vm0, %v5112_v1 }
 0x2f1   :  { %4620 = vmatprep.subr.bf16.mxu1 %v5110_v0 }
 0x2f4   :  { %4622 = vmatpush3.bf16.msra.mxu1 %v5261_v41 }
 0x2f5   :  { %4629 = vmatprep.subr.bf16.mxu1 %v5110_v0 }
 0x2f7   :  { %4179 = vmatmul.mubr.msk.f32.vlgmr.msra.gmra.mrb[2].mxu1 %vm110_vm1, %v217_v40 }
 0x2f8   :  { %4200 = vmatprep.mubr.msk.f32.mxu1 %vm5111_vm0, %v5112_v1 }
 0x353   :  { %v532_v36 = vpop.f32.mrb[4].mxu0 }
 0x354   :  { %v4191_v38 = vpop.f32.mrb[5].mxu0 }
 0x3c2   :  { %v286_v45 = vpop.f32.mrb[0].mxu1 }
 0x3c3   :  { %v290_v46 = vadd.f32 %v3854_v44, %v286_v45  ;;  %v4158_v47 = vpop.f32.mrb[1].mxu1 }
 0x3c5   :  { %4870 = vtanh.f32 %v290_v46  ;;  %v3862_v56 = vmul.f32 -1.442695, %v290_v46  ;;  %v5374_v46 = vld [vmem:[#allocation2 + $0x1] ss:$0 sm:$0xff] }
 0x3ca   :  { %v430_v49 = vpop.f32.mrb[2].mxu1 }
 0x3cb   :  { %v431_v50 = vadd.f32 %v430_v49, %v360_v42  ;;  %v4180_v51 = vpop.f32.mrb[3].mxu1 }
 0x3cc   :  { %v3863_v51 = vld [vmem:[%s5787_s0 + $0x10] sm:$0xff] }
 0x3cd   :  { %v434_v52 = vadd.f32 %v5274_v48, %v431_v50 }
 0x3cf   :  { %v4871_v53 = vpop.eup %4870  ;;  %4872 = vtanh.f32 %v434_v52  ;;  %v3858_v57 = vmul.f32 -1.442695, %v434_v52 }
 0x3d0   :  { %649 = vrot.lane.b32.xlu0 %v4871_v53, %s5113_s6  ;;  %4874 = vpow2.f32 %v3862_v56 }
 0x3d1   :  { %4876 = vpow2.f32 %v3858_v57 }
 0x3d9   :  { %v4873_v54 = vpop.eup %4872 }
 0x3da   :  { %448 = vrot.lane.b32.xlu1 %v4873_v54, %s5113_s6  ;;  %v4875_v58 = vpop.eup %4874 }
 0x3db   :  { %v643_v59 = vadd.f32 1.0, %v4875_v58  ;;  %v4877_v60 = vpop.eup %4876 }
 0x3dc   :  { %v438_v61 = vadd.f32 1.0, %v4877_v60 }
 0x3dd   :  { %4878 = vrcp.f32 %v643_v59 }
 0x3de   :  { %443 = vrot.lane.b32.xlu1 %v3849_v55, %s5114_s9  ;;  %4880 = vrcp.f32 %v438_v61  ;;  %v3851_v61 = vld [vmem:[%s5788_s1 + $0x28] sm:$0xff] }
 0x3e7   :  { %v4879_v62 = vpop.eup %4878 }
 0x3e8   :  { %v4881_v3 = vpop.eup %4880  ;;  %v647_v9 = vmul.f32 %v4879_v62, %v5214_v24  ;;  %v3837_v24 = vld [vmem:[%s5789_s2 + $0x80] sm:$0xff] }
 0x3e9   :  { %v5330_v26 = vpack.c.bf16 %v3838_v25, %v3837_v24 }
 0x3eb   :  { %4631 = vmatpush3.bf16.msra.mxu1 %v5330_v26 }
 0x3ec   :  { %4632 = vmatprep.subr.bf16.mxu1 %v5110_v0 }
 0x3ef   :  { %4634 = vmatpush3.bf16.msra.mxu1 %v5340_v30 }
 0x3f0   :  { %4641 = vmatprep.subr.bf16.mxu1 %v5110_v0 }
 0x442   :  { %v650_v63 = vpop.permute.xlu0 %649 }
 0x443   :  { %v652_v2 = vmul.f32 %v4879_v62, %v650_v63 }
 0x445   :  { %654 = vrot.lane.b32.xlu1 %v652_v2, %s5114_s9 }
 0x44c   :  { %v449_v4 = vpop.permute.xlu1 %448 }
 0x44d   :  { %v451_v6 = vmul.f32 %v4881_v3, %v449_v4 }
 0x44f   :  { %453 = vrot.lane.b32.xlu0 %v451_v6, %s5114_s9 }
 0x450   :  { %v444_v8 = vpop.permute.xlu1 %443 }
 0x451   :  { %v446_v12 = vmul.f32 %v4881_v3, %v444_v8 }
 0x4b7   :  { %v655_v10 = vpop.permute.xlu1 %654 }
 0x4b8   :  { %v5286_v11 = vadd.f32 %v655_v10, %v647_v9 }
 0x4ba   :  { %4882 = vtanh.f32 %v5286_v11 }
 0x4c1   :  { %v454_v13 = vpop.permute.xlu0 %453 }
 0x4c2   :  { %v5289_v14 = vadd.f32 %v454_v13, %v446_v12 }
 0x4c4   :  { %v4883_v15 = vpop.eup %4882  ;;  %4884 = vtanh.f32 %v5289_v14 }
 0x4c5   :  { %660 = vrot.lane.b32.xlu1 %v4883_v15, %s5113_s6 }
 0x4ce   :  { %v4885_v23 = vpop.eup %4884 }
 0x4cf   :  { %459 = vrot.lane.b32.xlu0 %v4885_v23, %s5113_s6 }
 0x537   :  { %v661_v32 = vpop.permute.xlu1 %660 }
 0x538   :  { %v663_v33 = vmul.f32 %v4879_v62, %v661_v32 }
 0x53a   :  { %667 = vrot.lane.b32.xlu1 %v663_v33, %s5114_s9 }
 0x541   :  { %v460_v34 = vpop.permute.xlu0 %459 }
 0x542   :  { %v462_v35 = vmul.f32 %v4881_v3, %v460_v34 }
 0x544   :  { %537 = vrot.lane.b32.xlu0 %v462_v35, %s5114_s9 }
 0x5ac   :  { %v668_v39 = vpop.permute.xlu1 %667 }
 0x5ad   :  { %4212 = vmatmul.mubr.msk.f32.vlgmr.msra.gmra.mrb[6].mxu0 %vm110_vm1, %v668_v39 }
 0x5ae   :  { %4649 = vmatpush3.bf16.msra.mxu0 %v5251_v37  ;;  %4233 = vmatprep.mubr.msk.f32.mxu0 %vm5111_vm0, %v5112_v1 }
 0x5af   :  { %4650 = vmatprep.subr.bf16.mxu0 %v5110_v0 }
 0x5b2   :  { %4652 = vmatpush3.bf16.msra.mxu0 %v5261_v41 }
 0x5b3   :  { %4659 = vmatprep.subr.bf16.mxu0 %v5110_v0 }
 0x5b5   :  { %4234 = vmatmul.mubr.msk.f32.vlgmr.msra.gmra.mrb[8].mxu0 %vm110_vm1, %v668_v39 }
 0x5b6   :  { %v538_v40 = vpop.permute.xlu0 %537  ;;  %4661 = vmatpush3.bf16.msra.mxu0 %v5330_v26  ;;  %4255 = vmatprep.mubr.msk.f32.mxu0 %vm5111_vm0, %v5112_v1 }
 0x5b7   :  { %4201 = vmatmul.mubr.msk.f32.vlgmr.msra.gmra.mrb[4].mxu1 %vm110_vm1, %v538_v40  ;;  %4662 = vmatprep.subr.bf16.mxu0 %v5110_v0 }
 0x5b8   :  { %4643 = vmatpush3.bf16.msra.mxu1 %v5223_v27  ;;  %4222 = vmatprep.mubr.msk.f32.mxu1 %vm5111_vm0, %v5112_v1 }
 0x5b9   :  { %4644 = vmatprep.subr.bf16.mxu1 %v5110_v0 }
 0x5ba   :  { %4664 = vmatpush3.bf16.msra.mxu0 %v5340_v30 }
 0x5bb   :  { %4671 = vmatprep.subr.bf16.mxu0 %v5110_v0 }
 0x5bc   :  { %4646 = vmatpush3.bf16.msra.mxu1 %v5234_v31 }
 0x5bd   :  { %4653 = vmatprep.subr.bf16.mxu1 %v5110_v0 }
 0x5bf   :  { %4223 = vmatmul.mubr.msk.f32.vlgmr.msra.gmra.mrb[6].mxu1 %vm110_vm1, %v538_v40 }
 0x5c0   :  { %4655 = vmatpush3.bf16.msra.mxu1 %v5302_v19  ;;  %4244 = vmatprep.mubr.msk.f32.mxu1 %vm5111_vm0, %v5112_v1 }
 0x5c1   :  { %4656 = vmatprep.subr.bf16.mxu1 %v5110_v0 }
 0x5c4   :  { %4658 = vmatpush3.bf16.msra.mxu1 %v5308_v21 }
 0x5c5   :  { %4665 = vmatprep.subr.bf16.mxu1 %v5110_v0 }
 0x680   :  { %v737_v42 = vpop.f32.mrb[6].mxu0 }
 0x681   :  { %v4213_v43 = vpop.f32.mrb[7].mxu0  ;;  %v741_v53 = vadd.f32 %v3863_v51, %v737_v42 }
 0x683   :  { %v3871_v63 = vmul.f32 -1.442695, %v741_v53 }
 0x688   :  { %v878_v44 = vpop.f32.mrb[8].mxu0 }
 0x689   :  { %v4235_v45 = vpop.f32.mrb[9].mxu0 }
 0x68a   :  { %v607_v47 = vpop.f32.mrb[4].mxu1 }
 0x68b   :  { %v608_v49 = vadd.f32 %v607_v47, %v532_v36  ;;  %v4202_v50 = vpop.f32.mrb[5].mxu1 }
 0x68d   :  { %v611_v52 = vadd.f32 %v5374_v46, %v608_v49 }
 0x68f   :  { %4886 = vtanh.f32 %v611_v52  ;;  %v3861_v62 = vmul.f32 -1.442695, %v611_v52 }
 0x690   :  { %4888 = vtanh.f32 %v741_v53 }
 0x692   :  { %v808_v54 = vpop.f32.mrb[6].mxu1 }
 0x693   :  { %v879_v55 = vadd.f32 %v878_v44, %v808_v54  ;;  %v4224_v56 = vpop.f32.mrb[7].mxu1 }
 0x695   :  { %v882_v57 = vadd.f32 %v5274_v48, %v879_v55 }
 0x697   :  { %4890 = vtanh.f32 %v882_v57  ;;  %v3867_v2 = vmul.f32 -1.442695, %v882_v57 }
 0x698   :  { %4892 = vpow2.f32 %v3861_v62 }
 0x699   :  { %v4887_v58 = vpop.eup %4886  ;;  %4894 = vpow2.f32 %v3871_v63 }
 0x69a   :  { %625 = vrot.lane.b32.xlu0 %v4887_v58, %s5113_s6  ;;  %v4889_v59 = vpop.eup %4888  ;;  %4896 = vpow2.f32 %v3867_v2 }
 0x69e   :  { %1091 = vrot.lane.b32.xlu0 %v4889_v59, %s5113_s6  ;;  %v3872_v59 = vld [vmem:[%s5787_s0 + $0x18] sm:$0xff] }
 0x6a1   :  { %v4891_v60 = vpop.eup %4890 }
 0x6a2   :  { %892 = vrot.lane.b32.xlu1 %v4891_v60, %s5113_s6  ;;  %v4893_v3 = vpop.eup %4892 }
 0x6a3   :  { %v615_v4 = vadd.f32 1.0, %v4893_v3  ;;  %v4895_v6 = vpop.eup %4894 }
 0x6a4   :  { %v1085_v8 = vadd.f32 1.0, %v4895_v6  ;;  %v4897_v9 = vpop.eup %4896 }
 0x6a5   :  { %4898 = vrcp.f32 %v615_v4  ;;  %v886_v10 = vadd.f32 1.0, %v4897_v9 }
 0x6a6   :  { %620 = vrot.lane.b32.xlu1 %v3851_v61, %s5114_s9  ;;  %4900 = vrcp.f32 %v1085_v8 }
 0x6a7   :  { %4902 = vrcp.f32 %v886_v10 }
 0x6af   :  { %v4899_v12 = vpop.eup %4898 }
 0x6b0   :  { %v4901_v16 = vpop.eup %4900 }
 0x6b1   :  { %v4903_v20 = vpop.eup %4902  ;;  %v1089_v32 = vmul.f32 %v4901_v16, %v5286_v11 }
 0x6b2   :  { %v890_v35 = vmul.f32 %v4903_v20, %v5289_v14 }
 0x70c   :  { %v626_v13 = vpop.permute.xlu0 %625 }
 0x70d   :  { %v628_v15 = vmul.f32 %v4899_v12, %v626_v13 }
 0x70f   :  { %630 = vrot.lane.b32.xlu0 %v628_v15, %s5114_s9 }
 0x710   :  { %v1092_v17 = vpop.permute.xlu0 %1091 }
 0x711   :  { %v1094_v18 = vmul.f32 %v4901_v16, %v1092_v17 }
 0x713   :  { %1096 = vrot.lane.b32.xlu0 %v1094_v18, %s5114_s9 }
 0x714   :  { %v893_v22 = vpop.permute.xlu1 %892 }
 0x715   :  { %v895_v23 = vmul.f32 %v4903_v20, %v893_v22 }
 0x717   :  { %897 = vrot.lane.b32.xlu1 %v895_v23, %s5114_s9 }
 0x718   :  { %v621_v24 = vpop.permute.xlu1 %620 }
 0x719   :  { %v623_v25 = vmul.f32 %v4899_v12, %v621_v24 }
 0x781   :  { %v631_v28 = vpop.permute.xlu0 %630 }
 0x782   :  { %v5391_v29 = vadd.f32 %v631_v28, %v623_v25 }
 0x784   :  { %4904 = vtanh.f32 %v5391_v29 }
 0x785   :  { %v1097_v33 = vpop.permute.xlu0 %1096 }
 0x786   :  { %v5395_v34 = vadd.f32 %v1097_v33, %v1089_v32 }
 0x788   :  { %4906 = vtanh.f32 %v5395_v34 }
 0x789   :  { %v898_v36 = vpop.permute.xlu1 %897 }
 0x78a   :  { %v5399_v38 = vadd.f32 %v898_v36, %v890_v35 }
 0x78c   :  { %4908 = vtanh.f32 %v5399_v38 }
 0x78e   :  { %v4905_v39 = vpop.eup %4904 }
 0x78f   :  { %636 = vrot.lane.b32.xlu1 %v4905_v39, %s5113_s6 }
 0x792   :  { %v4907_v40 = vpop.eup %4906 }
 0x793   :  { %1102 = vrot.lane.b32.xlu1 %v4907_v40, %s5113_s6 }
 0x796   :  { %v4909_v42 = vpop.eup %4908 }
 0x797   :  { %903 = vrot.lane.b32.xlu0 %v4909_v42, %s5113_s6 }
 0x801   :  { %v637_v11 = vpop.permute.xlu1 %636 }
 0x802   :  { %v639_v43 = vmul.f32 %v4899_v12, %v637_v11 }
 0x804   :  { %908 = vrot.lane.b32.xlu0 %v639_v43, %s5114_s9 }
 0x805   :  { %v1103_v44 = vpop.permute.xlu1 %1102 }
 0x806   :  { %v1105_v14 = vmul.f32 %v4901_v16, %v1103_v44 }
 0x808   :  { %1109 = vrot.lane.b32.xlu0 %v1105_v14, %s5114_s9 }
 0x809   :  { %v904_v45 = vpop.permute.xlu0 %903 }
 0x80a   :  { %v906_v47 = vmul.f32 %v4903_v20, %v904_v45 }
 0x80c   :  { %983 = vrot.lane.b32.xlu1 %v906_v47, %s5114_s9 }
 0x876   :  { %v909_v49 = vpop.permute.xlu0 %908 }
 0x877   :  { %4245 = vmatmul.mubr.msk.f32.vlgmr.msra.gmra.mrb[8].mxu1 %vm110_vm1, %v909_v49 }
 0x878   :  { %4667 = vmatpush3.bf16.msra.mxu1 %v5184_v5  ;;  %4266 = vmatprep.mubr.msk.f32.mxu1 %vm5111_vm0, %v5112_v1 }
 0x879   :  { %4668 = vmatprep.subr.bf16.mxu1 %v5110_v0 }
 0x87a   :  { %v1110_v50 = vpop.permute.xlu0 %1109 }
 0x87c   :  { %4670 = vmatpush3.bf16.msra.mxu1 %v5190_v7 }
 0x87d   :  { %4677 = vmatprep.subr.bf16.mxu1 %v5110_v0 }
 0x87e   :  { %v984_v51 = vpop.permute.xlu1 %983 }
 0x87f   :  { %4256 = vmatmul.mubr.msk.f32.vlgmr.msra.gmra.mrb[10].mxu0 %vm110_vm1, %v984_v51  ;;  %4267 = vmatmul.mubr.msk.f32.vlgmr.msra.gmra.mrb[10].mxu1 %vm110_vm1, %v1110_v50 }
 0x880   :  { %4673 = vmatpush3.bf16.msra.mxu0 %v5223_v27  ;;  %4679 = vmatpush3.bf16.msra.mxu1 %v5251_v37 }
 0x881   :  { %4674 = vmatprep.subr.bf16.mxu0 %v5110_v0  ;;  %4680 = vmatprep.subr.bf16.mxu1 %v5110_v0 }
 0x882   :  { %4277 = vmatprep.mubr.msk.f32.mxu0 %vm5111_vm0, %v5112_v1  ;;  %4288 = vmatprep.mubr.msk.f32.mxu1 %vm5111_vm0, %v5112_v1 }
 0x884   :  { %4676 = vmatpush3.bf16.msra.mxu0 %v5234_v31  ;;  %4682 = vmatpush3.bf16.msra.mxu1 %v5261_v41 }
 0x885   :  { %4683 = vmatprep.subr.bf16.mxu0 %v5110_v0  ;;  %4689 = vmatprep.subr.bf16.mxu1 %v5110_v0 }
 0x887   :  { %4278 = vmatmul.mubr.msk.f32.vlgmr.msra.gmra.mrb[12].mxu0 %vm110_vm1, %v984_v51  ;;  %4289 = vmatmul.mubr.msk.f32.vlgmr.msra.gmra.mrb[12].mxu1 %vm110_vm1, %v1110_v50 }
 0x888   :  { %4685 = vmatpush3.bf16.msra.mxu0 %v5302_v19  ;;  %4299 = vmatprep.mubr.msk.f32.mxu0 %vm5111_vm0, %v5112_v1 }
 0x889   :  { %4686 = vmatprep.subr.bf16.mxu0 %v5110_v0  ;;  %4691 = vmatpush3.bf16.msra.mxu1 %v5330_v26 }
 0x88a   :  { %4692 = vmatprep.subr.bf16.mxu1 %v5110_v0  ;;  %4310 = vmatprep.mubr.msk.f32.mxu1 %vm5111_vm0, %v5112_v1 }
 0x88c   :  { %4688 = vmatpush3.bf16.msra.mxu0 %v5308_v21 }
 0x88d   :  { %4695 = vmatprep.subr.bf16.mxu0 %v5110_v0  ;;  %4694 = vmatpush3.bf16.msra.mxu1 %v5340_v30 }
 0x88e   :  { %4701 = vmatprep.subr.bf16.mxu1 %v5110_v0 }
 0x94a   :  { %v978_v52 = vpop.f32.mrb[8].mxu1 }
 0x94b   :  { %v4246_v53 = vpop.f32.mrb[9].mxu1 }
 0x952   :  { %v1053_v54 = vpop.f32.mrb[10].mxu0  ;;  %v1179_v55 = vpop.f32.mrb[10].mxu1 }
 0x953   :  { %v1054_v56 = vadd.f32 %v1053_v54, %v978_v52  ;;  %v4257_v57 = vpop.f32.mrb[11].mxu0  ;;  %v4268_v58 = vpop.f32.mrb[11].mxu1  ;;  %v1183_v61 = vadd.f32 %v3872_v59, %v1179_v55 }
 0x955   :  { %v1057_v60 = vadd.f32 %v5374_v46, %v1054_v56  ;;  %v3880_v13 = vmul.f32 -1.442695, %v1183_v61 }
 0x957   :  { %4910 = vtanh.f32 %v1057_v60  ;;  %v3870_v12 = vmul.f32 -1.442695, %v1057_v60 }
 0x958   :  { %4912 = vtanh.f32 %v1183_v61 }
 0x95a   :  { %v1250_v62 = vpop.f32.mrb[12].mxu0  ;;  %v1320_v63 = vpop.f32.mrb[12].mxu1 }
 0x95b   :  { %v4279_v2 = vpop.f32.mrb[13].mxu0  ;;  %v1321_v3 = vadd.f32 %v1320_v63, %v1250_v62  ;;  %v4290_v4 = vpop.f32.mrb[13].mxu1 }
 0x95d   :  { %v1324_v6 = vadd.f32 %v5274_v48, %v1321_v3 }
 0x95f   :  { %4914 = vtanh.f32 %v1324_v6  ;;  %v3876_v15 = vmul.f32 -1.442695, %v1324_v6  ;;  %v3881_v6 = vld [vmem:[%s5787_s0 + $0x20] sm:$0xff] }
 0x960   :  { %4916 = vpow2.f32 %v3870_v12 }
 0x961   :  { %v4911_v8 = vpop.eup %4910  ;;  %4918 = vpow2.f32 %v3880_v13 }
 0x962   :  { %1067 = vrot.lane.b32.xlu1 %v4911_v8, %s5113_s6  ;;  %v4913_v9 = vpop.eup %4912  ;;  %4920 = vpow2.f32 %v3876_v15 }
 0x966   :  { %1533 = vrot.lane.b32.xlu1 %v4913_v9, %s5113_s6 }
 0x969   :  { %v4915_v10 = vpop.eup %4914 }
 0x96a   :  { %1334 = vrot.lane.b32.xlu0 %v4915_v10, %s5113_s6  ;;  %v4917_v16 = vpop.eup %4916 }
 0x96b   :  { %v1061_v17 = vadd.f32 1.0, %v4917_v16  ;;  %v4919_v18 = vpop.eup %4918 }
 0x96c   :  { %v1527_v20 = vadd.f32 1.0, %v4919_v18  ;;  %v4921_v22 = vpop.eup %4920 }
 0x96d   :  { %4922 = vrcp.f32 %v1061_v17  ;;  %v1328_v23 = vadd.f32 1.0, %v4921_v22 }
 0x96e   :  { %4924 = vrcp.f32 %v1527_v20 }
 0x96f   :  { %4926 = vrcp.f32 %v1328_v23 }
 0x977   :  { %v4923_v24 = vpop.eup %4922 }
 0x978   :  { %v4925_v32 = vpop.eup %4924  ;;  %v1065_v42 = vmul.f32 %v4923_v24, %v5391_v29 }
 0x979   :  { %v4927_v36 = vpop.eup %4926  ;;  %v1531_v44 = vmul.f32 %v4925_v32, %v5395_v34 }
 0x97a   :  { %v1332_v47 = vmul.f32 %v4927_v36, %v5399_v38 }
 0x9d4   :  { %v1068_v25 = vpop.permute.xlu1 %1067 }
 0x9d5   :  { %v1070_v28 = vmul.f32 %v4923_v24, %v1068_v25 }
 0x9d7   :  { %1072 = vrot.lane.b32.xlu0 %v1070_v28, %s5114_s9 }
 0x9d8   :  { %v1534_v33 = vpop.permute.xlu1 %1533 }
 0x9d9   :  { %v1536_v35 = vmul.f32 %v4925_v32, %v1534_v33 }
 0x9db   :  { %1538 = vrot.lane.b32.xlu0 %v1536_v35, %s5114_s9 }
 0x9dc   :  { %v1335_v39 = vpop.permute.xlu0 %1334 }
 0x9dd   :  { %v1337_v40 = vmul.f32 %v4927_v36, %v1335_v39 }
 0x9df   :  { %1339 = vrot.lane.b32.xlu1 %v1337_v40, %s5114_s9 }
 0xa49   :  { %v1073_v11 = vpop.permute.xlu0 %1072 }
 0xa4a   :  { %v5455_v43 = vadd.f32 %v1073_v11, %v1065_v42 }
 0xa4c   :  { %4928 = vtanh.f32 %v5455_v43 }
 0xa4d   :  { %v1539_v14 = vpop.permute.xlu0 %1538 }
 0xa4e   :  { %v5459_v45 = vadd.f32 %v1539_v14, %v1531_v44 }
 0xa50   :  { %4930 = vtanh.f32 %v5459_v45 }
 0xa51   :  { %v1340_v49 = vpop.permute.xlu1 %1339 }
 0xa52   :  { %v5463_v50 = vadd.f32 %v1340_v49, %v1332_v47 }
 0xa54   :  { %4932 = vtanh.f32 %v5463_v50 }
 0xa56   :  { %v4929_v29 = vpop.eup %4928 }
 0xa57   :  { %1078 = vrot.lane.b32.xlu1 %v4929_v29, %s5113_s6 }
 0xa5a   :  { %v4931_v51 = vpop.eup %4930 }
 0xa5b   :  { %1544 = vrot.lane.b32.xlu1 %v4931_v51, %s5113_s6 }
 0xa5e   :  { %v4933_v52 = vpop.eup %4932 }
 0xa5f   :  { %1345 = vrot.lane.b32.xlu0 %v4933_v52, %s5113_s6 }
 0xac9   :  { %v1079_v34 = vpop.permute.xlu1 %1078 }
 0xaca   :  { %v1081_v53 = vmul.f32 %v4923_v24, %v1079_v34 }
 0xacc   :  { %1350 = vrot.lane.b32.xlu0 %v1081_v53, %s5114_s9 }
 0xacd   :  { %v1545_v54 = vpop.permute.xlu1 %1544 }
 0xace   :  { %v1547_v38 = vmul.f32 %v4925_v32, %v1545_v54 }
 0xad0   :  { %1551 = vrot.lane.b32.xlu0 %v1547_v38, %s5114_s9 }
 0xad1   :  { %v1346_v55 = vpop.permute.xlu0 %1345 }
 0xad2   :  { %v1348_v56 = vmul.f32 %v4927_v36, %v1346_v55 }
 0xad4   :  { %1425 = vrot.lane.b32.xlu1 %v1348_v56, %s5114_s9 }
 0xb3e   :  { %v1351_v57 = vpop.permute.xlu0 %1350 }
 0xb3f   :  { %4300 = vmatmul.mubr.msk.f32.vlgmr.msra.gmra.mrb[14].mxu0 %vm110_vm1, %v1351_v57 }
 0xb40   :  { %4697 = vmatpush3.bf16.msra.mxu0 %v5184_v5  ;;  %4321 = vmatprep.mubr.msk.f32.mxu0 %vm5111_vm0, %v5112_v1 }
 0xb41   :  { %4698 = vmatprep.subr.bf16.mxu0 %v5110_v0 }
 0xb42   :  { %v1552_v58 = vpop.permute.xlu0 %1551 }
 0xb44   :  { %4700 = vmatpush3.bf16.msra.mxu0 %v5190_v7 }
 0xb45   :  { %4707 = vmatprep.subr.bf16.mxu0 %v5110_v0 }
 0xb46   :  { %v1426_v59 = vpop.permute.xlu1 %1425 }
 0xb47   :  { %4322 = vmatmul.mubr.msk.f32.vlgmr.msra.gmra.mrb[16].mxu0 %vm110_vm1, %v1552_v58  ;;  %4311 = vmatmul.mubr.msk.f32.vlgmr.msra.gmra.mrb[14].mxu1 %vm110_vm1, %v1426_v59 }
 0xb48   :  { %4703 = vmatpush3.bf16.msra.mxu1 %v5223_v27  ;;  %4709 = vmatpush3.bf16.msra.mxu0 %v5251_v37 }
 0xb49   :  { %4704 = vmatprep.subr.bf16.mxu1 %v5110_v0  ;;  %4710 = vmatprep.subr.bf16.mxu0 %v5110_v0 }
 0xb4a   :  { %4332 = vmatprep.mubr.msk.f32.mxu1 %vm5111_vm0, %v5112_v1  ;;  %4343 = vmatprep.mubr.msk.f32.mxu0 %vm5111_vm0, %v5112_v1 }
 0xb4c   :  { %4706 = vmatpush3.bf16.msra.mxu1 %v5234_v31  ;;  %4712 = vmatpush3.bf16.msra.mxu0 %v5261_v41 }
 0xb4d   :  { %4713 = vmatprep.subr.bf16.mxu1 %v5110_v0  ;;  %4719 = vmatprep.subr.bf16.mxu0 %v5110_v0 }
 0xb4f   :  { %4333 = vmatmul.mubr.msk.f32.vlgmr.msra.gmra.mrb[16].mxu1 %vm110_vm1, %v1426_v59  ;;  %4344 = vmatmul.mubr.msk.f32.vlgmr.msra.gmra.mrb[18].mxu0 %vm110_vm1, %v1552_v58 }
 0xb50   :  { %4715 = vmatpush3.bf16.msra.mxu1 %v5302_v19  ;;  %4354 = vmatprep.mubr.msk.f32.mxu1 %vm5111_vm0, %v5112_v1 }
 0xb51   :  { %4716 = vmatprep.subr.bf16.mxu1 %v5110_v0  ;;  %4721 = vmatpush3.bf16.msra.mxu0 %v5330_v26 }
 0xb52   :  { %4722 = vmatprep.subr.bf16.mxu0 %v5110_v0  ;;  %4365 = vmatprep.mubr.msk.f32.mxu0 %vm5111_vm0, %v5112_v1 }
 0xb54   :  { %4718 = vmatpush3.bf16.msra.mxu1 %v5308_v21 }
 0xb55   :  { %4725 = vmatprep.subr.bf16.mxu1 %v5110_v0  ;;  %4724 = vmatpush3.bf16.msra.mxu0 %v5340_v30 }
 0xb56   :  { %4731 = vmatprep.subr.bf16.mxu0 %v5110_v0 }
 0xc12   :  { %v1420_v60 = vpop.f32.mrb[14].mxu0 }
 0xc13   :  { %v4301_v61 = vpop.f32.mrb[15].mxu0 }
 0xc1a   :  { %v1621_v62 = vpop.f32.mrb[16].mxu0  ;;  %v1495_v63 = vpop.f32.mrb[14].mxu1 }
 0xc1b   :  { %v1496_v2 = vadd.f32 %v1495_v63, %v1420_v60  ;;  %v4323_v3 = vpop.f32.mrb[17].mxu0  ;;  %v4312_v4 = vpop.f32.mrb[15].mxu1  ;;  %v1625_v9 = vadd.f32 %v3881_v6, %v1621_v62 }
 0xc1d   :  { %v1499_v8 = vadd.f32 %v5374_v46, %v1496_v2  ;;  %v3889_v24 = vmul.f32 -1.442695, %v1625_v9 }
 0xc1f   :  { %4934 = vtanh.f32 %v1499_v8  ;;  %v3879_v23 = vmul.f32 -1.442695, %v1499_v8 }
 0xc20   :  { %4936 = vtanh.f32 %v1625_v9 }
 0xc22   :  { %v1692_v10 = vpop.f32.mrb[16].mxu1  ;;  %v1762_v12 = vpop.f32.mrb[18].mxu0 }
 0xc23   :  { %v1763_v13 = vadd.f32 %v1762_v12, %v1692_v10  ;;  %v4334_v15 = vpop.f32.mrb[17].mxu1  ;;  %v4345_v16 = vpop.f32.mrb[19].mxu0 }
 0xc24   :  { %v3890_v16 = vld [vmem:[%s5787_s0 + $0x28] sm:$0xff] }
 0xc25   :  { %v1766_v17 = vadd.f32 %v5274_v48, %v1763_v13 }
 0xc27   :  { %4938 = vtanh.f32 %v1766_v17  ;;  %v3885_v25 = vmul.f32 -1.442695, %v1766_v17 }
 0xc28   :  { %4940 = vpow2.f32 %v3879_v23 }
 0xc29   :  { %v4935_v18 = vpop.eup %4934  ;;  %4942 = vpow2.f32 %v3889_v24 }
 0xc2a   :  { %1509 = vrot.lane.b32.xlu1 %v4935_v18, %s5113_s6  ;;  %v4937_v20 = vpop.eup %4936  ;;  %4944 = vpow2.f32 %v3885_v25 }
 0xc2e   :  { %1975 = vrot.lane.b32.xlu1 %v4937_v20, %s5113_s6 }
 0xc31   :  { %v4939_v22 = vpop.eup %4938 }
 0xc32   :  { %1776 = vrot.lane.b32.xlu0 %v4939_v22, %s5113_s6  ;;  %v4941_v28 = vpop.eup %4940 }
 0xc33   :  { %v1503_v32 = vadd.f32 1.0, %v4941_v28  ;;  %v4943_v33 = vpop.eup %4942 }
 0xc34   :  { %v4945_v35 = vpop.eup %4944  ;;  %v1969_v36 = vadd.f32 1.0, %v4943_v33 }
 0xc35   :  { %4946 = vrcp.f32 %v1503_v32  ;;  %v1770_v39 = vadd.f32 1.0, %v4945_v35 }
 0xc36   :  { %4948 = vrcp.f32 %v1969_v36 }
 0xc37   :  { %4950 = vrcp.f32 %v1770_v39 }
 0xc3f   :  { %v4947_v40 = vpop.eup %4946 }
 0xc40   :  { %v4949_v44 = vpop.eup %4948  ;;  %v1507_v52 = vmul.f32 %v4947_v40, %v5455_v43 }
 0xc41   :  { %v4951_v49 = vpop.eup %4950  ;;  %v1973_v54 = vmul.f32 %v4949_v44, %v5459_v45 }
 0xc42   :  { %v1774_v56 = vmul.f32 %v4951_v49, %v5463_v50 }
 0xc9c   :  { %v1510_v42 = vpop.permute.xlu1 %1509 }
 0xc9d   :  { %v1512_v11 = vmul.f32 %v4947_v40, %v1510_v42 }
 0xc9f   :  { %1514 = vrot.lane.b32.xlu0 %v1512_v11, %s5114_s9 }
 0xca0   :  { %v1976_v14 = vpop.permute.xlu1 %1975 }
 0xca1   :  { %v1978_v47 = vmul.f32 %v4949_v44, %v1976_v14 }
 0xca3   :  { %1980 = vrot.lane.b32.xlu0 %v1978_v47, %s5114_s9 }
 0xca4   :  { %v1777_v29 = vpop.permute.xlu0 %1776 }
 0xca5   :  { %v1779_v51 = vmul.f32 %v4951_v49, %v1777_v29 }
 0xca7   :  { %1781 = vrot.lane.b32.xlu1 %v1779_v51, %s5114_s9 }
 0xd11   :  { %v1515_v34 = vpop.permute.xlu0 %1514 }
 0xd12   :  { %v5519_v53 = vadd.f32 %v1515_v34, %v1507_v52 }
 0xd14   :  { %4952 = vtanh.f32 %v5519_v53 }
 0xd15   :  { %v1981_v38 = vpop.permute.xlu0 %1980 }
 0xd16   :  { %v5523_v55 = vadd.f32 %v1981_v38, %v1973_v54 }
 0xd18   :  { %4954 = vtanh.f32 %v5523_v55 }
 0xd19   :  { %v1782_v57 = vpop.permute.xlu1 %1781 }
 0xd1a   :  { %v5527_v58 = vadd.f32 %v1782_v57, %v1774_v56 }
 0xd1c   :  { %4956 = vtanh.f32 %v5527_v58 }
 0xd1e   :  { %v4953_v43 = vpop.eup %4952 }
 0xd1f   :  { %1520 = vrot.lane.b32.xlu1 %v4953_v43, %s5113_s6 }
 0xd22   :  { %v4955_v59 = vpop.eup %4954 }
 0xd23   :  { %1986 = vrot.lane.b32.xlu1 %v4955_v59, %s5113_s6 }
 0xd26   :  { %v4957_v60 = vpop.eup %4956 }
 0xd27   :  { %1787 = vrot.lane.b32.xlu0 %v4957_v60, %s5113_s6 }
 0xd91   :  { %v1521_v45 = vpop.permute.xlu1 %1520 }
 0xd92   :  { %v1523_v61 = vmul.f32 %v4947_v40, %v1521_v45 }
 0xd94   :  { %1792 = vrot.lane.b32.xlu0 %v1523_v61, %s5114_s9 }
 0xd95   :  { %v1987_v50 = vpop.permute.xlu1 %1986 }
 0xd96   :  { %v1989_v62 = vmul.f32 %v4949_v44, %v1987_v50 }
 0xd98   :  { %1993 = vrot.lane.b32.xlu0 %v1989_v62, %s5114_s9 }
 0xd99   :  { %v1788_v63 = vpop.permute.xlu0 %1787 }
 0xd9a   :  { %v1790_v2 = vmul.f32 %v4951_v49, %v1788_v63 }
 0xd9c   :  { %1867 = vrot.lane.b32.xlu1 %v1790_v2, %s5114_s9 }
 0xe06   :  { %v1793_v3 = vpop.permute.xlu0 %1792 }
 0xe07   :  { %4355 = vmatmul.mubr.msk.f32.vlgmr.msra.gmra.mrb[18].mxu1 %vm110_vm1, %v1793_v3 }
 0xe08   :  { %4727 = vmatpush3.bf16.msra.mxu1 %v5184_v5  ;;  %4376 = vmatprep.mubr.msk.f32.mxu1 %vm5111_vm0, %v5112_v1 }
 0xe09   :  { %4728 = vmatprep.subr.bf16.mxu1 %v5110_v0 }
 0xe0a   :  { %v1994_v6 = vpop.permute.xlu0 %1993 }
 0xe0c   :  { %4730 = vmatpush3.bf16.msra.mxu1 %v5190_v7 }
 0xe0d   :  { %4737 = vmatprep.subr.bf16.mxu1 %v5110_v0 }
 0xe0e   :  { %v1868_v4 = vpop.permute.xlu1 %1867 }
 0xe0f   :  { %4366 = vmatmul.mubr.msk.f32.vlgmr.msra.gmra.mrb[20].mxu0 %vm110_vm1, %v1868_v4  ;;  %4377 = vmatmul.mubr.msk.f32.vlgmr.msra.gmra.mrb[20].mxu1 %vm110_vm1, %v1994_v6 }
 0xe10   :  { %4733 = vmatpush3.bf16.msra.mxu0 %v5223_v27  ;;  %4739 = vmatpush3.bf16.msra.mxu1 %v5251_v37 }
 0xe11   :  { %4734 = vmatprep.subr.bf16.mxu0 %v5110_v0  ;;  %4740 = vmatprep.subr.bf16.mxu1 %v5110_v0 }
 0xe12   :  { %4387 = vmatprep.mubr.msk.f32.mxu0 %vm5111_vm0, %v5112_v1  ;;  %4398 = vmatprep.mubr.msk.f32.mxu1 %vm5111_vm0, %v5112_v1 }
 0xe14   :  { %4736 = vmatpush3.bf16.msra.mxu0 %v5234_v31  ;;  %4742 = vmatpush3.bf16.msra.mxu1 %v5261_v41 }
 0xe15   :  { %4743 = vmatprep.subr.bf16.mxu0 %v5110_v0  ;;  %4749 = vmatprep.subr.bf16.mxu1 %v5110_v0 }
 0xe17   :  { %4388 = vmatmul.mubr.msk.f32.vlgmr.msra.gmra.mrb[22].mxu0 %vm110_vm1, %v1868_v4  ;;  %4399 = vmatmul.mubr.msk.f32.vlgmr.msra.gmra.mrb[22].mxu1 %vm110_vm1, %v1994_v6 }
 0xe18   :  { %4745 = vmatpush3.bf16.msra.mxu0 %v5302_v19  ;;  %4409 = vmatprep.mubr.msk.f32.mxu0 %vm5111_vm0, %v5112_v1 }
 0xe19   :  { %4746 = vmatprep.subr.bf16.mxu0 %v5110_v0  ;;  %4751 = vmatpush3.bf16.msra.mxu1 %v5330_v26 }
 0xe1a   :  { %4420 = vmatprep.mubr.msk.f32.mxu1 %vm5111_vm0, %v5112_v1  ;;  %4752 = vmatprep.subr.bf16.mxu1 %v5110_v0 }
 0xe1c   :  { %4748 = vmatpush3.bf16.msra.mxu0 %v5308_v21 }
 0xe1d   :  { %4755 = vmatprep.subr.bf16.mxu0 %v5110_v0  ;;  %4754 = vmatpush3.bf16.msra.mxu1 %v5340_v30 }
 0xe1e   :  { %4761 = vmatprep.subr.bf16.mxu1 %v5110_v0 }
 0xeda   :  { %v1862_v8 = vpop.f32.mrb[18].mxu1 }
 0xedb   :  { %v4356_v9 = vpop.f32.mrb[19].mxu1 }
 0xee2   :  { %v1937_v10 = vpop.f32.mrb[20].mxu0  ;;  %v2063_v13 = vpop.f32.mrb[20].mxu1 }
 0xee3   :  { %v1938_v12 = vadd.f32 %v1937_v10, %v1862_v8  ;;  %v4367_v15 = vpop.f32.mrb[21].mxu0  ;;  %v4378_v17 = vpop.f32.mrb[21].mxu1  ;;  %v2067_v20 = vadd.f32 %v3890_v16, %v2063_v13 }
 0xee5   :  { %v1941_v18 = vadd.f32 %v5374_v46, %v1938_v12  ;;  %v3898_v40 = vmul.f32 -1.442695, %v2067_v20 }
 0xee7   :  { %4958 = vtanh.f32 %v1941_v18  ;;  %v3888_v39 = vmul.f32 -1.442695, %v1941_v18 }
 0xee8   :  { %4960 = vtanh.f32 %v2067_v20 }
 0xeea   :  { %v2134_v22 = vpop.f32.mrb[22].mxu0  ;;  %v2204_v24 = vpop.f32.mrb[22].mxu1 }
 0xeeb   :  { %v4389_v23 = vpop.f32.mrb[23].mxu0  ;;  %v2205_v25 = vadd.f32 %v2204_v24, %v2134_v22  ;;  %v4400_v28 = vpop.f32.mrb[23].mxu1 }
 0xeec   :  { %v3899_v28 = vld [vmem:[%s5787_s0 + $0x30] sm:$0xff] }
 0xeed   :  { %v2208_v32 = vadd.f32 %v5274_v48, %v2205_v25 }
 0xeef   :  { %4962 = vtanh.f32 %v2208_v32  ;;  %v3894_v42 = vmul.f32 -1.442695, %v2208_v32 }
 0xef0   :  { %4964 = vpow2.f32 %v3888_v39 }
 0xef1   :  { %v4959_v33 = vpop.eup %4958  ;;  %4966 = vpow2.f32 %v3898_v40 }
 0xef2   :  { %1951 = vrot.lane.b32.xlu1 %v4959_v33, %s5113_s6  ;;  %v4961_v35 = vpop.eup %4960  ;;  %4968 = vpow2.f32 %v3894_v42 }
 0xef6   :  { %2417 = vrot.lane.b32.xlu1 %v4961_v35, %s5113_s6 }
 0xef9   :  { %v4963_v36 = vpop.eup %4962 }
 0xefa   :  { %2218 = vrot.lane.b32.xlu0 %v4963_v36, %s5113_s6  ;;  %v4965_v11 = vpop.eup %4964 }
 0xefb   :  { %v1945_v44 = vadd.f32 1.0, %v4965_v11  ;;  %v4967_v14 = vpop.eup %4966  ;;  %v5639_v11 = vld [vmem:[#allocation2] ss:$0 sm:$0xff] }
 0xefc   :  { %v2411_v48 = vadd.f32 1.0, %v4967_v14  ;;  %v4969_v47 = vpop.eup %4968 }
 0xefd   :  { %4970 = vrcp.f32 %v1945_v44  ;;  %v2212_v49 = vadd.f32 1.0, %v4969_v47 }
 0xefe   :  { %4972 = vrcp.f32 %v2411_v48 }
 0xeff   :  { %4974 = vrcp.f32 %v2212_v49 }
 0xf07   :  { %v4971_v29 = vpop.eup %4970 }
 0xf08   :  { %v4973_v34 = vpop.eup %4972  ;;  %v1949_v59 = vmul.f32 %v4971_v29, %v5519_v53 }
 0xf09   :  { %v4975_v56 = vpop.eup %4974  ;;  %v2415_v61 = vmul.f32 %v4973_v34, %v5523_v55 }
 0xf0a   :  { %v2216_v63 = vmul.f32 %v4975_v56, %v5527_v58 }
 0xf64   :  { %v1952_v51 = vpop.permute.xlu1 %1951 }
 0xf65   :  { %v1954_v52 = vmul.f32 %v4971_v29, %v1952_v51 }
 0xf67   :  { %1956 = vrot.lane.b32.xlu0 %v1954_v52, %s5114_s9 }
 0xf68   :  { %v2418_v54 = vpop.permute.xlu1 %2417 }
 0xf69   :  { %v2420_v38 = vmul.f32 %v4973_v34, %v2418_v54 }
 0xf6b   :  { %2422 = vrot.lane.b32.xlu0 %v2420_v38, %s5114_s9 }
 0xf6c   :  { %v2219_v57 = vpop.permute.xlu0 %2218 }
 0xf6d   :  { %v2221_v43 = vmul.f32 %v4975_v56, %v2219_v57 }
 0xf6f   :  { %2223 = vrot.lane.b32.xlu1 %v2221_v43, %s5114_s9 }
 0xfd9   :  { %v1957_v60 = vpop.permute.xlu0 %1956 }
 0xfda   :  { %v5583_v45 = vadd.f32 %v1957_v60, %v1949_v59 }
 0xfdc   :  { %4976 = vtanh.f32 %v5583_v45 }
 0xfdd   :  { %v2423_v50 = vpop.permute.xlu0 %2422 }
 0xfde   :  { %v5587_v62 = vadd.f32 %v2423_v50, %v2415_v61 }
 0xfe0   :  { %4978 = vtanh.f32 %v5587_v62 }
 0xfe1   :  { %v2224_v2 = vpop.permute.xlu1 %2223 }
 0xfe2   :  { %v5591_v3 = vadd.f32 %v2224_v2, %v2216_v63 }
 0xfe4   :  { %4980 = vtanh.f32 %v5591_v3 }
 0xfe6   :  { %v4977_v53 = vpop.eup %4976 }
 0xfe7   :  { %1962 = vrot.lane.b32.xlu1 %v4977_v53, %s5113_s6 }
 0xfea   :  { %v4979_v4 = vpop.eup %4978 }
 0xfeb   :  { %2428 = vrot.lane.b32.xlu1 %v4979_v4, %s5113_s6 }
 0xfee   :  { %v4981_v6 = vpop.eup %4980 }
 0xfef   :  { %2229 = vrot.lane.b32.xlu0 %v4981_v6, %s5113_s6 }
0x1059   :  { %v1963_v55 = vpop.permute.xlu1 %1962 }
0x105a   :  { %v1965_v8 = vmul.f32 %v4971_v29, %v1963_v55 }
0x105c   :  { %2234 = vrot.lane.b32.xlu0 %v1965_v8, %s5114_s9 }
0x105d   :  { %v2429_v9 = vpop.permute.xlu1 %2428 }
0x105e   :  { %v2431_v58 = vmul.f32 %v4973_v34, %v2429_v9 }
0x1060   :  { %2435 = vrot.lane.b32.xlu0 %v2431_v58, %s5114_s9 }
0x1061   :  { %v2230_v10 = vpop.permute.xlu0 %2229 }
0x1062   :  { %v2232_v12 = vmul.f32 %v4975_v56, %v2230_v10 }
0x1064   :  { %2309 = vrot.lane.b32.xlu1 %v2232_v12, %s5114_s9 }
0x10ce   :  { %v2235_v13 = vpop.permute.xlu0 %2234 }
0x10cf   :  { %4410 = vmatmul.mubr.msk.f32.vlgmr.msra.gmra.mrb[24].mxu0 %vm110_vm1, %v2235_v13 }
0x10d0   :  { %4757 = vmatpush3.bf16.msra.mxu0 %v5184_v5  ;;  %4431 = vmatprep.mubr.msk.f32.mxu0 %vm5111_vm0, %v5112_v1 }
0x10d1   :  { %4758 = vmatprep.subr.bf16.mxu0 %v5110_v0 }
0x10d2   :  { %v2436_v15 = vpop.permute.xlu0 %2435 }
0x10d4   :  { %4760 = vmatpush3.bf16.msra.mxu0 %v5190_v7 }
0x10d5   :  { %4767 = vmatprep.subr.bf16.mxu0 %v5110_v0 }
0x10d6   :  { %v2310_v16 = vpop.permute.xlu1 %2309 }
0x10d7   :  { %4432 = vmatmul.mubr.msk.f32.vlgmr.msra.gmra.mrb[26].mxu0 %vm110_vm1, %v2436_v15  ;;  %4421 = vmatmul.mubr.msk.f32.vlgmr.msra.gmra.mrb[24].mxu1 %vm110_vm1, %v2310_v16 }
0x10d8   :  { %4769 = vmatpush3.bf16.msra.mxu0 %v5251_v37  ;;  %4763 = vmatpush3.bf16.msra.mxu1 %v5223_v27 }
0x10d9   :  { %4770 = vmatprep.subr.bf16.mxu0 %v5110_v0  ;;  %4764 = vmatprep.subr.bf16.mxu1 %v5110_v0 }
0x10da   :  { %4442 = vmatprep.mubr.msk.f32.mxu1 %vm5111_vm0, %v5112_v1  ;;  %4453 = vmatprep.mubr.msk.f32.mxu0 %vm5111_vm0, %v5112_v1 }
0x10dc   :  { %4772 = vmatpush3.bf16.msra.mxu0 %v5261_v41  ;;  %4766 = vmatpush3.bf16.msra.mxu1 %v5234_v31 }
0x10dd   :  { %4779 = vmatprep.subr.bf16.mxu0 %v5110_v0  ;;  %4773 = vmatprep.subr.bf16.mxu1 %v5110_v0 }
0x10df   :  { %4454 = vmatmul.mubr.msk.f32.vlgmr.msra.gmra.mrb[28].mxu0 %vm110_vm1, %v2436_v15  ;;  %4443 = vmatmul.mubr.msk.f32.vlgmr.msra.gmra.mrb[26].mxu1 %vm110_vm1, %v2310_v16 }
0x10e0   :  { %4781 = vmatpush3.bf16.msra.mxu0 %v5330_v26  ;;  %4775 = vmatpush3.bf16.msra.mxu1 %v5302_v19 }
0x10e1   :  { %4464 = vmatprep.mubr.msk.f32.mxu1 %vm5111_vm0, %v5112_v1  ;;  %4776 = vmatprep.subr.bf16.mxu1 %v5110_v0 }
0x10e2   :  { %4782 = vmatprep.subr.bf16.mxu0 %v5110_v0  ;;  %4475 = vmatprep.mubr.msk.f32.mxu0 %vm5111_vm0, %v5112_v1 }
0x10e4   :  { %4784 = vmatpush3.bf16.msra.mxu0 %v5340_v30  ;;  %4778 = vmatpush3.bf16.msra.mxu1 %v5308_v21 }
0x10e5   :  { %4791 = vmatprep.subr.bf16.mxu0 %v5110_v0  ;;  %4785 = vmatprep.subr.bf16.mxu1 %v5110_v0 }
0x11a2   :  { %v2304_v17 = vpop.f32.mrb[24].mxu0 }
0x11a3   :  { %v4411_v18 = vpop.f32.mrb[25].mxu0 }
0x11aa   :  { %v2505_v20 = vpop.f32.mrb[26].mxu0  ;;  %v2379_v22 = vpop.f32.mrb[24].mxu1 }
0x11ab   :  { %v4433_v23 = vpop.f32.mrb[27].mxu0  ;;  %v2380_v24 = vadd.f32 %v2379_v22, %v2304_v17  ;;  %v4422_v25 = vpop.f32.mrb[25].mxu1  ;;  %v2509_v33 = vadd.f32 %v3899_v28, %v2505_v20 }
0x11ad   :  { %v2383_v32 = vadd.f32 %v5374_v46, %v2380_v24  ;;  %v3907_v49 = vmul.f32 -1.442695, %v2509_v33 }
0x11af   :  { %4982 = vtanh.f32 %v2383_v32  ;;  %v3897_v47 = vmul.f32 -1.442695, %v2383_v32 }
0x11b0   :  { %4984 = vtanh.f32 %v2509_v33 }
0x11b2   :  { %v2646_v35 = vpop.f32.mrb[28].mxu0  ;;  %v2576_v36 = vpop.f32.mrb[26].mxu1 }
0x11b3   :  { %v4455_v39 = vpop.f32.mrb[29].mxu0  ;;  %v2647_v40 = vadd.f32 %v2646_v35, %v2576_v36  ;;  %v4444_v42 = vpop.f32.mrb[27].mxu1 }
0x11b4   :  { %v3908_v39 = vld [vmem:[%s5787_s0 + $0x38] sm:$0xff] }
0x11b5   :  { %v2650_v44 = vadd.f32 %v5639_v11, %v2647_v40  ;;  %v5704_v40 = vld [vmem:[#allocation2 + $0x1] ss:$0 sm:$0xff] }
0x11b7   :  { %4986 = vtanh.f32 %v2650_v44  ;;  %v3903_v29 = vmul.f32 -1.442695, %v2650_v44 }
0x11b8   :  { %4988 = vpow2.f32 %v3897_v47 }
0x11b9   :  { %v4983_v14 = vpop.eup %4982  ;;  %4990 = vpow2.f32 %v3907_v49 }
0x11ba   :  { %2393 = vrot.lane.b32.xlu1 %v4983_v14, %s5113_s6  ;;  %v4985_v48 = vpop.eup %4984  ;;  %4992 = vpow2.f32 %v3903_v29 }
0x11be   :  { %2859 = vrot.lane.b32.xlu1 %v4985_v48, %s5113_s6 }
0x11c1   :  { %v4987_v46 = vpop.eup %4986 }
0x11c2   :  { %2660 = vrot.lane.b32.xlu0 %v4987_v46, %s5113_s6  ;;  %v4989_v51 = vpop.eup %4988 }
0x11c3   :  { %v2387_v52 = vadd.f32 1.0, %v4989_v51  ;;  %v4991_v34 = vpop.eup %4990 }
0x11c4   :  { %v2853_v54 = vadd.f32 1.0, %v4991_v34  ;;  %v4993_v38 = vpop.eup %4992 }
0x11c5   :  { %4994 = vrcp.f32 %v2387_v52  ;;  %v2654_v56 = vadd.f32 1.0, %v4993_v38 }
0x11c6   :  { %4996 = vrcp.f32 %v2853_v54 }
0x11c7   :  { %4998 = vrcp.f32 %v2654_v56 }
0x11cf   :  { %v4995_v57 = vpop.eup %4994 }
0x11d0   :  { %v4997_v60 = vpop.eup %4996  ;;  %v2391_v4 = vmul.f32 %v4995_v57, %v5583_v45 }
0x11d1   :  { %v4999_v63 = vpop.eup %4998  ;;  %v2857_v8 = vmul.f32 %v4997_v60, %v5587_v62 }
0x11d2   :  { %v2658_v10 = vmul.f32 %v4999_v63, %v5591_v3 }
0x122c   :  { %v2394_v43 = vpop.permute.xlu1 %2393 }
0x122d   :  { %v2396_v59 = vmul.f32 %v4995_v57, %v2394_v43 }
0x122f   :  { %2398 = vrot.lane.b32.xlu0 %v2396_v59, %s5114_s9 }
0x1230   :  { %v2860_v61 = vpop.permute.xlu1 %2859 }
0x1231   :  { %v2862_v50 = vmul.f32 %v4997_v60, %v2860_v61 }
0x1233   :  { %2864 = vrot.lane.b32.xlu0 %v2862_v50, %s5114_s9 }
0x1234   :  { %v2661_v2 = vpop.permute.xlu0 %2660 }
0x1235   :  { %v2663_v53 = vmul.f32 %v4999_v63, %v2661_v2 }
0x1237   :  { %2665 = vrot.lane.b32.xlu1 %v2663_v53, %s5114_s9 }
0x12a1   :  { %v2399_v6 = vpop.permute.xlu0 %2398 }
0x12a2   :  { %v5649_v55 = vadd.f32 %v2399_v6, %v2391_v4 }
0x12a4   :  { %5000 = vtanh.f32 %v5649_v55 }
0x12a5   :  { %v2865_v9 = vpop.permute.xlu0 %2864 }
0x12a6   :  { %v5653_v58 = vadd.f32 %v2865_v9, %v2857_v8 }
0x12a8   :  { %5002 = vtanh.f32 %v5653_v58 }
0x12a9   :  { %v2666_v12 = vpop.permute.xlu1 %2665 }
0x12aa   :  { %v5657_v13 = vadd.f32 %v2666_v12, %v2658_v10 }
0x12ac   :  { %5004 = vtanh.f32 %v5657_v13 }
0x12ae   :  { %v5001_v45 = vpop.eup %5000 }
0x12af   :  { %2404 = vrot.lane.b32.xlu1 %v5001_v45, %s5113_s6 }
0x12b2   :  { %v5003_v15 = vpop.eup %5002 }
0x12b3   :  { %2870 = vrot.lane.b32.xlu1 %v5003_v15, %s5113_s6 }
0x12b6   :  { %v5005_v16 = vpop.eup %5004 }
0x12b7   :  { %2671 = vrot.lane.b32.xlu0 %v5005_v16, %s5113_s6 }
0x1321   :  { %v2405_v62 = vpop.permute.xlu1 %2404 }
0x1322   :  { %v2407_v17 = vmul.f32 %v4995_v57, %v2405_v62 }
0x1324   :  { %2676 = vrot.lane.b32.xlu0 %v2407_v17, %s5114_s9 }
0x1325   :  { %v2871_v18 = vpop.permute.xlu1 %2870 }
0x1326   :  { %v2873_v3 = vmul.f32 %v4997_v60, %v2871_v18 }
0x1328   :  { %2877 = vrot.lane.b32.xlu0 %v2873_v3, %s5114_s9 }
0x1329   :  { %v2672_v20 = vpop.permute.xlu0 %2671 }
0x132a   :  { %v2674_v22 = vmul.f32 %v4999_v63, %v2672_v20 }
0x132c   :  { %2751 = vrot.lane.b32.xlu1 %v2674_v22, %s5114_s9 }
0x1396   :  { %v2677_v23 = vpop.permute.xlu0 %2676 }
0x1397   :  { %4465 = vmatmul.mubr.msk.f32.vlgmr.msra.gmra.mrb[28].mxu1 %vm110_vm1, %v2677_v23 }
0x1398   :  { %4787 = vmatpush3.bf16.msra.mxu1 %v5184_v5  ;;  %4486 = vmatprep.mubr.msk.f32.mxu1 %vm5111_vm0, %v5112_v1 }
0x1399   :  { %4788 = vmatprep.subr.bf16.mxu1 %v5110_v0 }
0x139a   :  { %v2878_v24 = vpop.permute.xlu0 %2877 }
0x139c   :  { %4790 = vmatpush3.bf16.msra.mxu1 %v5190_v7 }
0x139d   :  { %4797 = vmatprep.subr.bf16.mxu1 %v5110_v0 }
0x139e   :  { %v2752_v25 = vpop.permute.xlu1 %2751 }
0x139f   :  { %4476 = vmatmul.mubr.msk.f32.vlgmr.msra.gmra.mrb[30].mxu0 %vm110_vm1, %v2752_v25  ;;  %4487 = vmatmul.mubr.msk.f32.vlgmr.msra.gmra.mrb[30].mxu1 %vm110_vm1, %v2878_v24 }
0x13a0   :  { %4793 = vmatpush3.bf16.msra.mxu0 %v5223_v27  ;;  %4799 = vmatpush3.bf16.msra.mxu1 %v5251_v37 }
0x13a1   :  { %4794 = vmatprep.subr.bf16.mxu0 %v5110_v0  ;;  %4800 = vmatprep.subr.bf16.mxu1 %v5110_v0 }
0x13a2   :  { %4497 = vmatprep.mubr.msk.f32.mxu0 %vm5111_vm0, %v5112_v1  ;;  %4508 = vmatprep.mubr.msk.f32.mxu1 %vm5111_vm0, %v5112_v1 }
0x13a4   :  { %4796 = vmatpush3.bf16.msra.mxu0 %v5234_v31  ;;  %4802 = vmatpush3.bf16.msra.mxu1 %v5261_v41 }
0x13a5   :  { %4803 = vmatprep.subr.bf16.mxu0 %v5110_v0  ;;  %4809 = vmatprep.subr.bf16.mxu1 %v5110_v0 }
0x13a7   :  { %4498 = vmatmul.mubr.msk.f32.vlgmr.msra.gmra.mrb[32].mxu0 %vm110_vm1, %v2752_v25  ;;  %4509 = vmatmul.mubr.msk.f32.vlgmr.msra.gmra.mrb[32].mxu1 %vm110_vm1, %v2878_v24 }
0x13a8   :  { %4805 = vmatpush3.bf16.msra.mxu0 %v5302_v19  ;;  %4519 = vmatprep.mubr.msk.f32.mxu0 %vm5111_vm0, %v5112_v1 }
0x13a9   :  { %4806 = vmatprep.subr.bf16.mxu0 %v5110_v0  ;;  %4811 = vmatpush3.bf16.msra.mxu1 %v5330_v26 }
0x13aa   :  { %4812 = vmatprep.subr.bf16.mxu1 %v5110_v0  ;;  %4530 = vmatprep.mubr.msk.f32.mxu1 %vm5111_vm0, %v5112_v1 }
0x13ac   :  { %4808 = vmatpush3.bf16.msra.mxu0 %v5308_v21 }
0x13ad   :  { %4815 = vmatprep.subr.bf16.mxu0 %v5110_v0  ;;  %4814 = vmatpush3.bf16.msra.mxu1 %v5340_v30 }
0x13ae   :  { %4821 = vmatprep.subr.bf16.mxu1 %v5110_v0 }
0x146a   :  { %v2746_v5 = vpop.f32.mrb[28].mxu1 }
0x146b   :  { %v4466_v7 = vpop.f32.mrb[29].mxu1 }
0x1472   :  { %v2821_v28 = vpop.f32.mrb[30].mxu0  ;;  %v2947_v32 = vpop.f32.mrb[30].mxu1 }
0x1473   :  { %v2822_v33 = vadd.f32 %v2821_v28, %v2746_v5  ;;  %v4477_v35 = vpop.f32.mrb[31].mxu0  ;;  %v4488_v36 = vpop.f32.mrb[31].mxu1  ;;  %v2951_v44 = vadd.f32 %v3908_v39, %v2947_v32 }
0x1475   :  { %v2825_v42 = vadd.f32 %v5704_v40, %v2822_v33  ;;  %v3916_v38 = vmul.f32 -1.442695, %v2951_v44 }
0x1477   :  { %5006 = vtanh.f32 %v2825_v42  ;;  %v3906_v54 = vmul.f32 -1.442695, %v2825_v42 }
0x1478   :  { %5008 = vtanh.f32 %v2951_v44 }
0x147a   :  { %v3018_v14 = vpop.f32.mrb[32].mxu0  ;;  %v3088_v48 = vpop.f32.mrb[32].mxu1 }
0x147b   :  { %v4499_v46 = vpop.f32.mrb[33].mxu0  ;;  %v3089_v47 = vadd.f32 %v3088_v48, %v3018_v14  ;;  %v4510_v49 = vpop.f32.mrb[33].mxu1 }
0x147d   :  { %v3092_v29 = vadd.f32 %v5639_v11, %v3089_v47 }
0x147f   :  { %5010 = vtanh.f32 %v3092_v29  ;;  %v3912_v56 = vmul.f32 -1.442695, %v3092_v29 }
0x1480   :  { %5012 = vpow2.f32 %v3906_v54 }
0x1481   :  { %v5007_v51 = vpop.eup %5006  ;;  %5014 = vpow2.f32 %v3916_v38 }
0x1482   :  { %2835 = vrot.lane.b32.xlu1 %v5007_v51, %s5113_s6  ;;  %v5009_v52 = vpop.eup %5008  ;;  %5016 = vpow2.f32 %v3912_v56 }
0x1486   :  { %3301 = vrot.lane.b32.xlu1 %v5009_v52, %s5113_s6 }
0x1489   :  { %v5011_v34 = vpop.eup %5010 }
0x148a   :  { %3102 = vrot.lane.b32.xlu0 %v5011_v34, %s5113_s6  ;;  %v5013_v57 = vpop.eup %5012 }
0x148b   :  { %v2829_v43 = vadd.f32 1.0, %v5013_v57  ;;  %v5015_v59 = vpop.eup %5014 }
0x148c   :  { %v3295_v60 = vadd.f32 1.0, %v5015_v59  ;;  %v5017_v61 = vpop.eup %5016 }
0x148d   :  { %5018 = vrcp.f32 %v2829_v43  ;;  %v3096_v50 = vadd.f32 1.0, %v5017_v61 }
0x148e   :  { %5020 = vrcp.f32 %v3295_v60 }
0x148f   :  { %5022 = vrcp.f32 %v3096_v50 }
0x1497   :  { %v5019_v63 = vpop.eup %5018 }
0x1498   :  { %v5021_v4 = vpop.eup %5020  ;;  %v2833_v45 = vmul.f32 %v5019_v63, %v5649_v55 }
0x1499   :  { %v5023_v9 = vpop.eup %5022  ;;  %v3299_v62 = vmul.f32 %v5021_v4, %v5653_v58 }
0x149a   :  { %v3100_v3 = vmul.f32 %v5023_v9, %v5657_v13 }
0x14f4   :  { %v2836_v2 = vpop.permute.xlu1 %2835 }
0x14f5   :  { %v2838_v53 = vmul.f32 %v5019_v63, %v2836_v2 }
0x14f7   :  { %2840 = vrot.lane.b32.xlu0 %v2838_v53, %s5114_s9 }
0x14f8   :  { %v3302_v6 = vpop.permute.xlu1 %3301 }
0x14f9   :  { %v3304_v8 = vmul.f32 %v5021_v4, %v3302_v6 }
0x14fb   :  { %3306 = vrot.lane.b32.xlu0 %v3304_v8, %s5114_s9 }
0x14fc   :  { %v3103_v10 = vpop.permute.xlu0 %3102 }
0x14fd   :  { %v3105_v12 = vmul.f32 %v5023_v9, %v3103_v10 }
0x14ff   :  { %3107 = vrot.lane.b32.xlu1 %v3105_v12, %s5114_s9 }
0x1569   :  { %v2841_v15 = vpop.permute.xlu0 %2840 }
0x156a   :  { %v5715_v16 = vadd.f32 %v2841_v15, %v2833_v45 }
0x156c   :  { %5024 = vtanh.f32 %v5715_v16 }
0x156d   :  { %v3307_v17 = vpop.permute.xlu0 %3306 }
0x156e   :  { %v3309_v18 = vadd.f32 %v3307_v17, %v3299_v62 }
0x1570   :  { %5026 = vtanh.f32 %v3309_v18 }
0x1571   :  { %v3108_v20 = vpop.permute.xlu1 %3107 }
0x1572   :  { %v5720_v22 = vadd.f32 %v3108_v20, %v3100_v3 }
0x1574   :  { %5028 = vtanh.f32 %v5720_v22 }
0x1576   :  { %v5025_v23 = vpop.eup %5024 }
0x1577   :  { %2846 = vrot.lane.b32.xlu1 %v5025_v23, %s5113_s6 }
0x157a   :  { %v5027_v55 = vpop.eup %5026 }
0x157b   :  { %3312 = vrot.lane.b32.xlu1 %v5027_v55, %s5113_s6 }
0x157e   :  { %v5029_v24 = vpop.eup %5028 }
0x157f   :  { %3113 = vrot.lane.b32.xlu0 %v5029_v24, %s5113_s6 }
0x15e9   :  { %v2847_v58 = vpop.permute.xlu1 %2846 }
0x15ea   :  { %v2849_v25 = vmul.f32 %v5019_v63, %v2847_v58 }
0x15ec   :  { %3118 = vrot.lane.b32.xlu0 %v2849_v25, %s5114_s9 }
0x15ed   :  { %v3313_v5 = vpop.permute.xlu1 %3312 }
0x15ee   :  { %v3315_v13 = vmul.f32 %v5021_v4, %v3313_v5 }
0x15f0   :  { %3387 = vrot.lane.b32.xlu0 %v3315_v13, %s5114_s9  ;;  %v89_v13 = vld [vmem:[#allocation4] sm:$0xff] }
0x15f1   :  { %v3114_v7 = vpop.permute.xlu0 %3113 }
0x15f2   :  { %v3116_v28 = vmul.f32 %v5023_v9, %v3114_v7  ;;  %v91_v7 = vld [vmem:[#allocation4 + $0x10] sm:$0xff] }
0x15f4   :  { %3193 = vrot.lane.b32.xlu1 %v3116_v28, %s5114_s9 }
0x165e   :  { %v3119_v32 = vpop.permute.xlu0 %3118 }
0x165f   :  { %4520 = vmatmul.mubr.msk.f32.vlgmr.msra.gmra.mrb[34].mxu0 %vm110_vm1, %v3119_v32  ;;  %v92_v32 = vld [vmem:[#allocation4 + $0x18] sm:$0xff] }
0x1660   :  { %4817 = vmatpush3.bf16.msra.mxu0 %v5223_v27  ;;  %4541 = vmatprep.mubr.msk.f32.mxu0 %vm5111_vm0, %v5112_v1 }
0x1661   :  { %4818 = vmatprep.subr.bf16.mxu0 %v5110_v0 }
0x1662   :  { %v3388_v27 = vpop.permute.xlu0 %3387 }
0x1664   :  { %4820 = vmatpush3.bf16.msra.mxu0 %v5234_v31 }
0x1665   :  { %4827 = vmatprep.subr.bf16.mxu0 %v5110_v0 }
0x1666   :  { %v3194_v33 = vpop.permute.xlu1 %3193 }
0x1667   :  { %4531 = vmatmul.mubr.msk.f32.vlgmr.msra.gmra.mrb[34].mxu1 %vm110_vm1, %v3194_v33  ;;  %4542 = vmatmul.mubr.msk.f32.vlgmr.msra.gmra.mrb[36].mxu0 %vm110_vm1, %v3194_v33  ;;  %v4843_v33 = vpack.c.bf16 %v92_v32, %v91_v7 }
0x1668   :  { %4823 = vmatpush3.bf16.msra.mxu1 %v5251_v37  ;;  %4552 = vmatprep.mubr.msk.f32.mxu1 %vm5111_vm0, %v5112_v1 }
0x1669   :  { %4824 = vmatprep.subr.bf16.mxu1 %v5110_v0  ;;  %4829 = vmatpush3.bf16.msra.mxu0 %v5302_v19 }
0x166a   :  { %4830 = vmatprep.subr.bf16.mxu0 %v5110_v0  ;;  %4563 = vmatprep.mubr.msk.f32.mxu0 %vm5111_vm0, %v5112_v1 }
0x166c   :  { %4826 = vmatpush3.bf16.msra.mxu1 %v5261_v41 }
0x166d   :  { %4832 = vmatpush3.bf16.msra.mxu0 %v5308_v21  ;;  %4833 = vmatprep.subr.bf16.mxu1 %v5110_v0 }
0x166e   :  { %4839 = vmatprep.subr.bf16.mxu0 %v5110_v0 }
0x166f   :  { %4553 = vmatmul.mubr.msk.f32.vlgmr.msra.gmra.mrb[36].mxu1 %vm110_vm1, %v3388_v27 }
0x1670   :  { %4835 = vmatpush3.bf16.msra.mxu1 %v5330_v26  ;;  %4574 = vmatprep.mubr.msk.f32.mxu1 %vm5111_vm0, %v5112_v1 }
0x1671   :  { %4836 = vmatprep.subr.bf16.mxu1 %v5110_v0 }
0x1674   :  { %4838 = vmatpush3.bf16.msra.mxu1 %v5340_v30 }
0x1675   :  { %4845 = vmatprep.subr.bf16.mxu1 %v5110_v0 }
0x1732   :  { %v3188_v31 = vpop.f32.mrb[34].mxu0 }
0x1733   :  { %v4521_v37 = vpop.f32.mrb[35].mxu0 }
0x1734   :  { %v95_v37 = vld [vmem:[#allocation4 + $0x28] sm:$0xff] }
0x173a   :  { %v3263_v41 = vpop.f32.mrb[34].mxu1  ;;  %v3382_v19 = vpop.f32.mrb[36].mxu0 }
0x173b   :  { %v3264_v21 = vadd.f32 %v3263_v41, %v3188_v31  ;;  %v4532_v35 = vpop.f32.mrb[35].mxu1  ;;  %v4543_v36 = vpop.f32.mrb[37].mxu0  ;;  %v94_v31 = vld [vmem:[#allocation4 + $0x20] sm:$0xff] }
0x173c   :  { %v4846_v41 = vpack.c.bf16 %v95_v37, %v94_v31  ;;  %v96_v36 = vld [vmem:[#allocation4 + $0x30] sm:$0xff] }
0x173d   :  { %v3267_v39 = vadd.f32 %v5704_v40, %v3264_v21 }
0x173f   :  { %5030 = vtanh.f32 %v3267_v39  ;;  %v3915_v46 = vmul.f32 -1.442695, %v3267_v39  ;;  %v97_v39 = vld [vmem:[#allocation4 + $0x38] sm:$0xff] }
0x1742   :  { %v3457_v26 = vpop.f32.mrb[36].mxu1 }
0x1743   :  { %v3458_v42 = vadd.f32 %v3457_v26, %v3382_v19  ;;  %v4554_v44 = vpop.f32.mrb[37].mxu1  ;;  %v4849_v26 = vpack.c.bf16 %v97_v39, %v96_v36 }
0x1745   :  { %v3461_v14 = vadd.f32 %v5639_v11, %v3458_v42  ;;  %v3923_v42 = vld [vmem:[#allocation2 + $0x2] ss:$0 sm:$0xff] }
0x1747   :  { %5032 = vtanh.f32 %v3461_v14  ;;  %v3919_v47 = vmul.f32 -1.442695, %v3461_v14 }
0x1748   :  { %5034 = vpow2.f32 %v3915_v46  ;;  %v3925_v46 = vld [vmem:[#allocation2 + $0x3] ss:$0 sm:$0xff] }
0x1749   :  { %v5031_v48 = vpop.eup %5030  ;;  %5036 = vpow2.f32 %v3919_v47 }
0x174a   :  { %3277 = vrot.lane.b32.xlu1 %v5031_v48, %s5113_s6 }
0x1751   :  { %v5033_v30 = vpop.eup %5032 }
0x1752   :  { %3471 = vrot.lane.b32.xlu0 %v5033_v30, %s5113_s6  ;;  %v5035_v49 = vpop.eup %5034 }
0x1753   :  { %v3271_v29 = vadd.f32 1.0, %v5035_v49  ;;  %v5037_v51 = vpop.eup %5036 }
0x1754   :  { %v3465_v52 = vadd.f32 1.0, %v5037_v51 }
0x1755   :  { %5038 = vrcp.f32 %v3271_v29 }
0x1756   :  { %5040 = vrcp.f32 %v3465_v52 }
0x175f   :  { %v5039_v34 = vpop.eup %5038 }
0x1760   :  { %v5041_v38 = vpop.eup %5040  ;;  %v3275_v43 = vmul.f32 %v5039_v34, %v5715_v16 }
0x1761   :  { %v3469_v61 = vmul.f32 %v5041_v38, %v5720_v22 }
0x17bc   :  { %v3278_v54 = vpop.permute.xlu1 %3277 }
0x17bd   :  { %v3280_v11 = vmul.f32 %v5039_v34, %v3278_v54 }
0x17bf   :  { %3282 = vrot.lane.b32.xlu1 %v3280_v11, %s5114_s9 }
0x17c4   :  { %v3472_v56 = vpop.permute.xlu0 %3471 }
0x17c5   :  { %v3474_v57 = vmul.f32 %v5041_v38, %v3472_v56 }
0x17c7   :  { %3476 = vrot.lane.b32.xlu0 %v3474_v57, %s5114_s9 }
0x1831   :  { %v3283_v59 = vpop.permute.xlu1 %3282 }
0x1832   :  { %v3285_v60 = vadd.f32 %v3283_v59, %v3275_v43 }
0x1834   :  { %5042 = vtanh.f32 %v3285_v60 }
0x1839   :  { %v3477_v50 = vpop.permute.xlu0 %3476 }
0x183a   :  { %v3479_v63 = vadd.f32 %v3477_v50, %v3469_v61 }
0x183c   :  { %5044 = vtanh.f32 %v3479_v63 }
0x183e   :  { %v5043_v2 = vpop.eup %5042 }
0x183f   :  { %3288 = vrot.lane.b32.xlu1 %v5043_v2, %s5113_s6 }
0x1846   :  { %v5045_v53 = vpop.eup %5044 }
0x1847   :  { %3482 = vrot.lane.b32.xlu0 %v5045_v53, %s5113_s6 }
0x18b1   :  { %v3289_v4 = vpop.permute.xlu1 %3288 }
0x18b2   :  { %v3291_v6 = vmul.f32 %v5039_v34, %v3289_v4 }
0x18b4   :  { %3487 = vrot.lane.b32.xlu1 %v3291_v6, %s5114_s9 }
0x18b9   :  { %v3483_v8 = vpop.permute.xlu0 %3482 }
0x18ba   :  { %v3485_v9 = vmul.f32 %v5041_v38, %v3483_v8 }
0x18bc   :  { %3562 = vrot.lane.b32.xlu0 %v3485_v9, %s5114_s9 }
0x1926   :  { %v3488_v10 = vpop.permute.xlu1 %3487 }
0x1927   :  { %4564 = vmatmul.mubr.msk.f32.vlgmr.msra.gmra.mrb[38].mxu0 %vm110_vm1, %v3488_v10 }
0x1928   :  { %4585 = vmatprep.mubr.msk.f32.mxu0 %vm5111_vm0, %v5112_v1 }
0x192e   :  { %v3563_v12 = vpop.permute.xlu0 %3562 }
0x192f   :  { %4575 = vmatmul.mubr.msk.f32.vlgmr.msra.gmra.mrb[38].mxu1 %vm110_vm1, %v3563_v12 }
0x1930   :  { %4596 = vmatprep.mubr.msk.f32.mxu1 %vm5111_vm0, %v5112_v1  ;;  %4847 = vmatpush3.bf16.msra.mxu1 %v4846_v41 }
0x1931   :  { %4848 = vmatprep.subr.bf16.mxu1 %v5110_v0 }
0x1934   :  { %4850 = vmatpush3.bf16.msra.mxu1 %v4849_v26 }
0x19fa   :  { %v3557_v45 = vpop.f32.mrb[38].mxu0 }
0x19fb   :  { %v4565_v15 = vpop.f32.mrb[39].mxu0 }
0x1a02   :  { %v3632_v16 = vpop.f32.mrb[38].mxu1 }
0x1a03   :  { %v3633_v62 = vadd.f32 %v3632_v16, %v3557_v45  ;;  %v4576_v17 = vpop.f32.mrb[39].mxu1 }
0x1a05   :  { %v3636_v18 = vadd.f32 %v5704_v40, %v3633_v62  ;;  %v90_v40 = vld [vmem:[#allocation4 + $0x8] sm:$0xff] }
0x1a06   :  { %v4840_v28 = vpack.c.bf16 %v90_v40, %v89_v13 }
0x1a07   :  { %5046 = vtanh.f32 %v3636_v18  ;;  %v3922_v20 = vmul.f32 -1.442695, %v3636_v18 }
0x1a08   :  { %4841 = vmatpush3.bf16.msra.mxu0 %v4840_v28 }
0x1a09   :  { %5048 = vpow2.f32 %v3922_v20  ;;  %4842 = vmatprep.subr.bf16.mxu0 %v5110_v0 }
0x1a0c   :  { %4844 = vmatpush3.bf16.msra.mxu0 %v4843_v33 }
0x1a11   :  { %v5047_v3 = vpop.eup %5046 }
0x1a12   :  { %3646 = vrot.lane.b32.xlu1 %v5047_v3, %s5113_s6 }
0x1a13   :  { %v5049_v22 = vpop.eup %5048 }
0x1a14   :  { %v3640_v23 = vadd.f32 1.0, %v5049_v22 }
0x1a16   :  { %5050 = vrcp.f32 %v3640_v23 }
0x1a20   :  { %v5051_v55 = vpop.eup %5050 }
0x1a21   :  { %v3644_v1 = vmul.f32 %v5051_v55, %v3285_v60 }
0x1a84   :  { %v3647_v24 = vpop.permute.xlu1 %3646 }
0x1a85   :  { %v3649_v58 = vmul.f32 %v5051_v55, %v3647_v24 }
0x1a87   :  { %3651 = vrot.lane.b32.xlu0 %v3649_v58, %s5114_s9 }
0x1af9   :  { %v3652_v25 = vpop.permute.xlu0 %3651 }
0x1afa   :  { %v3654_v5 = vadd.f32 %v3652_v25, %v3644_v1 }
0x1afc   :  { %5052 = vtanh.f32 %v3654_v5 }
0x1b06   :  { %v5053_v27 = vpop.eup %5052 }
0x1b07   :  { %3657 = vrot.lane.b32.xlu1 %v5053_v27, %s5113_s6 }
0x1b79   :  { %v3658_v19 = vpop.permute.xlu1 %3657 }
0x1b7a   :  { %v3660_v21 = vmul.f32 %v5051_v55, %v3658_v19 }
0x1b7c   :  { %3668 = vrot.lane.b32.xlu0 %v3660_v21, %s5114_s9 }
0x1bee   :  { %v3669_v35 = vpop.permute.xlu0 %3668 }
0x1bef   :  { %4586 = vmatmul.mubr.msk.f32.vlgmr.msra.gmra.mrb[40].mxu0 %vm110_vm1, %v3669_v35 }
0x1cc2   :  { %v3738_v44 = vpop.f32.mrb[40].mxu0 }
0x1cc3   :  { %v3739_v14 = vadd.f32 %v3923_v42, %v3738_v44  ;;  %v4587_v48 = vpop.f32.mrb[41].mxu0 }
0x1cc5   :  { %v3742_v30 = vmax.f32 %v3739_v14, 0.0 }
0x1cc7   :  { %4597 = vmatmul.mubr.msk.f32.vlgmr.msra.gmra.mrb[40].mxu1 %vm110_vm1, %v3742_v30 }
0x1d9a   :  { %v3818_v0 = vpop.f32.mrb[40].mxu1 }
0x1d9b   :  { %v3819_v47 = vadd.f32 %v3925_v46, %v3818_v0  ;;  %v4598_v49 = vpop.f32.mrb[41].mxu1 }
0x1d9d   :  { %3822 = vst [vmem:[%s5792_s5] sm:$0xff] %v3819_v47 }
0x1d9e   :  { %3827 = vsyncpa [#allocation3], 1 }
0x1d9f   :  { %3828 = vsyncpa [#allocation5], 1 }

</bundles_post_ra>
